<compile_context>
chip_gen: v6e
topology: v6e:2x2x1
jax: 0.10.0
libtpu: 0.0.40
codegen_flags: <defaults>
</compile_context>

<pallas_src>
import jax
import jax.numpy as jnp
from jax.experimental import pallas as pl
from jax.experimental.pallas import tpu as pltpu


# ----------------------------------------------------------------------------
# Pallas kernel: fused attention-MLP (two 1x1 convs) + gated fusion
# ----------------------------------------------------------------------------
def _attention_fusion_kernel(x1_ref, x2_ref, x3_ref,
                             w1a_ref, w1b_ref, w1c_ref, b1_ref,
                             w2_ref, b2_ref,
                             o_ref):
    # x*_ref : (1, C, THW)  one image, one spatial tile (channels on sublanes,
    #                       spatial on lanes)
    # w1*_ref: (Cr, C)      first 1x1 conv, split per input branch
    # b1_ref : (Cr, 1)
    # w2_ref : (3C, Cr)     second 1x1 conv (all three output branches)
    # b2_ref : (3C, 1)
    # o_ref  : (1, C, THW)
    x1 = x1_ref[0]                                              # (C, THW)
    x2 = x2_ref[0]
    x3 = x3_ref[0]
    C = x1.shape[0]

    # Hidden layer: ReLU(W1 @ concat(x1,x2,x3) + b1), computed as a sum of
    # three matmuls so the 3C concat is never materialized.
    h = jnp.dot(w1a_ref[...], x1, preferred_element_type=jnp.float32)
    h = h + jnp.dot(w1b_ref[...], x2, preferred_element_type=jnp.float32)
    h = h + jnp.dot(w1c_ref[...], x3, preferred_element_type=jnp.float32)
    h = jnp.maximum(h + b1_ref[...], 0.0)                       # (Cr, THW)

    # Attention maps for all three branches in one matmul:   (3C, THW)
    attn = jax.nn.sigmoid(
        jnp.dot(w2_ref[...], h, preferred_element_type=jnp.float32) + b2_ref[...])

    # Aligned sublane slices (C is a multiple of 8) -> free register selects.
    a1 = attn[:C]
    a2 = attn[C:2 * C]
    a3 = attn[2 * C:]

    o_ref[0] = (x1 * a1 + x2 * a2 + x3 * a3).astype(o_ref.dtype)


# ----------------------------------------------------------------------------
# Wrapper
# ----------------------------------------------------------------------------
def _round_up(x, m):
    return ((x + m - 1) // m) * m


def attention_fusion_pallas(x1, x2, x3, params, *, hw_tile=2048):
    """x1, x2, x3: (N, C, H, W) float32 -> (N, C, H, W), PyTorch semantics."""
    N, C, H, W = x1.shape
    HW = H * W
    w1, b1, w2, b2 = params["w1"], params["b1"], params["w2"], params["b2"]
    Cr = w1.shape[0]

    # Split the first conv's weight per branch (host-side, one-time, tiny).
    w1a, w1b, w1c = w1[:, :C], w1[:, C:2 * C], w1[:, 2 * C:]        # (Cr, C)
    b1r = b1.reshape(Cr, 1)
    b2r = b2.reshape(3 * C, 1)

    # Flatten spatial dims onto the lane axis; choose a lane-dense tile.
    thw = min(hw_tile, _round_up(HW, 128))
    hw_pad = _round_up(HW, thw)

    def prep(x):
        xf = x.reshape(N, C, HW)                                    # free reshape
        if hw_pad != HW:
            xf = jnp.pad(xf, ((0, 0), (0, 0), (0, hw_pad - HW)))
        return xf

    x1f, x2f, x3f = prep(x1), prep(x2), prep(x3)

    grid = (N, hw_pad // thw)
    x_spec = pl.BlockSpec((1, C, thw), lambda n, t: (n, 0, t))
    const2d = lambda n, t: (0, 0)

    out = pl.pallas_call(
        _attention_fusion_kernel,
        out_shape=jax.ShapeDtypeStruct((N, C, hw_pad), jnp.float32),
        grid=grid,
        in_specs=[
            x_spec, x_spec, x_spec,
            pl.BlockSpec((Cr, C), const2d),
            pl.BlockSpec((Cr, C), const2d),
            pl.BlockSpec((Cr, C), const2d),
            pl.BlockSpec((Cr, 1), const2d),
            pl.BlockSpec((3 * C, Cr), const2d),
            pl.BlockSpec((3 * C, 1), const2d),
        ],
        out_specs=pl.BlockSpec((1, C, thw), lambda n, t: (n, 0, t)),
        compiler_params=pltpu.CompilerParams(
            dimension_semantics=("parallel", "parallel"),
        ),
    )(x1f, x2f, x3f, w1a, w1b, w1c, b1r, w2, b2r)

    if hw_pad != HW:
        out = out[:, :, :HW]
    return out.reshape(N, C, H, W)


# ----------------------------------------------------------------------------
# Params + pure-JAX reference (for validation only)
# ----------------------------------------------------------------------------
def init_params(key, channels, reduction=8):
    Cr = max(channels // reduction, 1)
    C3 = channels * 3
    k1, k2, k3, k4 = jax.random.split(key, 4)
    return dict(
        w1=jax.random.normal(k1, (Cr, C3), jnp.float32) * 0.1,   # conv1 weight
        b1=jax.random.normal(k2, (Cr,), jnp.float32) * 0.1,      # conv1 bias
        w2=jax.random.normal(k3, (C3, Cr), jnp.float32) * 0.1,   # conv2 weight
        b2=jax.random.normal(k4, (C3,), jnp.float32) * 0.1,      # conv2 bias
    )


def attention_fusion_ref(x1, x2, x3, params):
    x = jnp.concatenate([x1, x2, x3], axis=1)                    # (N, 3C, H, W)
    h = jnp.einsum("oc,nchw->nohw", params["w1"], x)
    h = jnp.maximum(h + params["b1"][None, :, None, None], 0.0)
    a = jnp.einsum("oc,nchw->nohw", params["w2"], h)
    a = jax.nn.sigmoid(a + params["b2"][None, :, None, None])
    C = x1.shape[1]
    return x1 * a[:, :C] + x2 * a[:, C:2 * C] + x3 * a[:, 2 * C:]


if __name__ == "__main__":
    key = jax.random.PRNGKey(0)
    kx1, kx2, kx3, kp = jax.random.split(key, 4)

    # Small deterministic example; reduction=8 requires channels >= 8.
    N, channels, H, W = 2, 64, 16, 16
    x1 = jax.random.normal(kx1, (N, channels, H, W), jnp.float32)
    x2 = jax.random.normal(kx2, (N, channels, H, W), jnp.float32)
    x3 = jax.random.normal(kx3, (N, channels, H, W), jnp.float32)

    params = init_params(kp, channels, reduction=8)

    out = attention_fusion_pallas(x1, x2, x3, params)
    out = jax.block_until_ready(out)

    assert out.shape == (N, channels, H, W), out.shape
    assert jnp.all(jnp.isfinite(out))

    ref = attention_fusion_ref(x1, x2, x3, params)
    assert jnp.allclose(out, ref, rtol=1e-4, atol=1e-4), (
        float(jnp.max(jnp.abs(out - ref))))

    print("KERNEL_OK")
</pallas_src>

<mosaic_0001>
module attributes {stable_mosaic.version = 11 : i64} {
  func.func @_attention_fusion_kernel(%arg0: i32, %arg1: i32, %arg2: memref<1x64x256xf32, #tpu.memory_space<vmem>>, %arg3: memref<1x64x256xf32, #tpu.memory_space<vmem>>, %arg4: memref<1x64x256xf32, #tpu.memory_space<vmem>>, %arg5: memref<8x64xf32, #tpu.memory_space<vmem>>, %arg6: memref<8x64xf32, #tpu.memory_space<vmem>>, %arg7: memref<8x64xf32, #tpu.memory_space<vmem>>, %arg8: memref<8x1xf32, #tpu.memory_space<vmem>>, %arg9: memref<192x8xf32, #tpu.memory_space<vmem>>, %arg10: memref<192x1xf32, #tpu.memory_space<vmem>>, %arg11: memref<1x64x256xf32, #tpu.memory_space<vmem>>) attributes {dimension_semantics = [#tpu.dimension_semantics<parallel>, #tpu.dimension_semantics<parallel>], iteration_bounds = array<i64: 2, 1>, scalar_prefetch = 0 : i64, scratch_operands = 0 : i64, tpu.core_type = #tpu.core_type<tc>, window_params = [{transform_indices = @transform_0, window_bounds = array<i64: 1, 64, 256>}, {transform_indices = @transform_1, window_bounds = array<i64: 1, 64, 256>}, {transform_indices = @transform_2, window_bounds = array<i64: 1, 64, 256>}, {pipeline_mode = #tpu.pipeline_mode<synchronous>, transform_indices = @transform_3, window_bounds = array<i64: 8, 64>}, {pipeline_mode = #tpu.pipeline_mode<synchronous>, transform_indices = @transform_4, window_bounds = array<i64: 8, 64>}, {pipeline_mode = #tpu.pipeline_mode<synchronous>, transform_indices = @transform_5, window_bounds = array<i64: 8, 64>}, {pipeline_mode = #tpu.pipeline_mode<synchronous>, transform_indices = @transform_6, window_bounds = array<i64: 8, 1>}, {pipeline_mode = #tpu.pipeline_mode<synchronous>, transform_indices = @transform_7, window_bounds = array<i64: 192, 8>}, {pipeline_mode = #tpu.pipeline_mode<synchronous>, transform_indices = @transform_8, window_bounds = array<i64: 192, 1>}, {transform_indices = @transform_9, window_bounds = array<i64: 1, 64, 256>}]} {
    %c0 = arith.constant 0 : index
    %c0_0 = arith.constant 0 : index
    %c0_1 = arith.constant 0 : index
    %0 = vector.load %arg2[%c0, %c0_0, %c0_1] : memref<1x64x256xf32, #tpu.memory_space<vmem>>, vector<1x64x256xf32>
    %1 = vector.shape_cast %0 : vector<1x64x256xf32> to vector<64x256xf32>
    %c0_2 = arith.constant 0 : index
    %c0_3 = arith.constant 0 : index
    %c0_4 = arith.constant 0 : index
    %2 = vector.load %arg3[%c0_2, %c0_3, %c0_4] : memref<1x64x256xf32, #tpu.memory_space<vmem>>, vector<1x64x256xf32>
    %3 = vector.shape_cast %2 : vector<1x64x256xf32> to vector<64x256xf32>
    %c0_5 = arith.constant 0 : index
    %c0_6 = arith.constant 0 : index
    %c0_7 = arith.constant 0 : index
    %4 = vector.load %arg4[%c0_5, %c0_6, %c0_7] : memref<1x64x256xf32, #tpu.memory_space<vmem>>, vector<1x64x256xf32>
    %5 = vector.shape_cast %4 : vector<1x64x256xf32> to vector<64x256xf32>
    %c0_8 = arith.constant 0 : index
    %c0_9 = arith.constant 0 : index
    %6 = vector.load %arg5[%c0_8, %c0_9] : memref<8x64xf32, #tpu.memory_space<vmem>>, vector<8x64xf32>
    %cst = arith.constant dense<0.000000e+00> : vector<8x256xf32>
    %7 = tpu.matmul %6, %1, %cst {dimension_numbers = #tpu.dot_dimension_numbers<[1], [0], [0], [1], [0, 0, 1, 1], [], []>} : vector<8x64xf32>, vector<64x256xf32>, vector<8x256xf32> -> vector<8x256xf32>
    %c0_10 = arith.constant 0 : index
    %c0_11 = arith.constant 0 : index
    %8 = vector.load %arg6[%c0_10, %c0_11] : memref<8x64xf32, #tpu.memory_space<vmem>>, vector<8x64xf32>
    %cst_12 = arith.constant dense<0.000000e+00> : vector<8x256xf32>
    %9 = tpu.matmul %8, %3, %cst_12 {dimension_numbers = #tpu.dot_dimension_numbers<[1], [0], [0], [1], [0, 0, 1, 1], [], []>} : vector<8x64xf32>, vector<64x256xf32>, vector<8x256xf32> -> vector<8x256xf32>
    %10 = arith.addf %7, %9 : vector<8x256xf32>
    %c0_13 = arith.constant 0 : index
    %c0_14 = arith.constant 0 : index
    %11 = vector.load %arg7[%c0_13, %c0_14] : memref<8x64xf32, #tpu.memory_space<vmem>>, vector<8x64xf32>
    %cst_15 = arith.constant dense<0.000000e+00> : vector<8x256xf32>
    %12 = tpu.matmul %11, %5, %cst_15 {dimension_numbers = #tpu.dot_dimension_numbers<[1], [0], [0], [1], [0, 0, 1, 1], [], []>} : vector<8x64xf32>, vector<64x256xf32>, vector<8x256xf32> -> vector<8x256xf32>
    %13 = arith.addf %10, %12 : vector<8x256xf32>
    %c0_16 = arith.constant 0 : index
    %c0_17 = arith.constant 0 : index
    %14 = vector.load %arg8[%c0_16, %c0_17] : memref<8x1xf32, #tpu.memory_space<vmem>>, vector<8x1xf32>
    %15 = vector.broadcast %14 : vector<8x1xf32> to vector<8x256xf32>
    %16 = arith.addf %13, %15 : vector<8x256xf32>
    %cst_18 = arith.constant 0.000000e+00 : f32
    %17 = vector.broadcast %cst_18 : f32 to vector<8x256xf32>
    %18 = arith.maximumf %16, %17 : vector<8x256xf32>
    %c0_19 = arith.constant 0 : index
    %c0_20 = arith.constant 0 : index
    %19 = vector.load %arg9[%c0_19, %c0_20] : memref<192x8xf32, #tpu.memory_space<vmem>>, vector<192x8xf32>
    %cst_21 = arith.constant dense<0.000000e+00> : vector<192x256xf32>
    %20 = tpu.matmul %19, %18, %cst_21 {dimension_numbers = #tpu.dot_dimension_numbers<[1], [0], [0], [1], [0, 0, 1, 1], [], []>} : vector<192x8xf32>, vector<8x256xf32>, vector<192x256xf32> -> vector<192x256xf32>
    %c0_22 = arith.constant 0 : index
    %c0_23 = arith.constant 0 : index
    %21 = vector.load %arg10[%c0_22, %c0_23] : memref<192x1xf32, #tpu.memory_space<vmem>>, vector<192x1xf32>
    %22 = vector.broadcast %21 : vector<192x1xf32> to vector<192x256xf32>
    %23 = arith.addf %20, %22 : vector<192x256xf32>
    %24 = arith.negf %23 : vector<192x256xf32>
    %25 = math.exp %24 : vector<192x256xf32>
    %cst_24 = arith.constant 1.000000e+00 : f32
    %26 = vector.broadcast %cst_24 : f32 to vector<192x256xf32>
    %27 = arith.addf %26, %25 : vector<192x256xf32>
    %28 = arith.divf %26, %27 : vector<192x256xf32>
    %29 = vector.extract_strided_slice %28 {offsets = [0, 0], sizes = [64, 256], strides = [1, 1]} : vector<192x256xf32> to vector<64x256xf32>
    %30 = vector.extract_strided_slice %28 {offsets = [64, 0], sizes = [64, 256], strides = [1, 1]} : vector<192x256xf32> to vector<64x256xf32>
    %31 = vector.extract_strided_slice %28 {offsets = [128, 0], sizes = [64, 256], strides = [1, 1]} : vector<192x256xf32> to vector<64x256xf32>
    %32 = arith.mulf %1, %29 : vector<64x256xf32>
    %33 = arith.mulf %3, %30 : vector<64x256xf32>
    %34 = arith.addf %32, %33 : vector<64x256xf32>
    %35 = arith.mulf %5, %31 : vector<64x256xf32>
    %36 = arith.addf %34, %35 : vector<64x256xf32>
    %c0_25 = arith.constant 0 : index
    %c0_26 = arith.constant 0 : index
    %c0_27 = arith.constant 0 : index
    %37 = vector.load %arg11[%c0_25, %c0_26, %c0_27] : memref<1x64x256xf32, #tpu.memory_space<vmem>>, vector<1x64x256xf32>
    %38 = vector.shape_cast %37 : vector<1x64x256xf32> to vector<64x256xf32>
    %39 = vector.shape_cast %36 : vector<64x256xf32> to vector<1x64x256xf32>
    tpu.vector_store %arg11[%c0_25, %c0_26, %c0_27], %39 {strides = array<i32>} : memref<1x64x256xf32, #tpu.memory_space<vmem>>, vector<1x64x256xf32>,
    return
  }
  func.func @transform_0(%arg0: i32, %arg1: i32) -> (i32, i32, i32) {
    %c0_i32 = arith.constant 0 : i32
    %c0_i32_0 = arith.constant 0 : i32
    return %arg0, %c0_i32, %arg1 : i32, i32, i32
  }
  func.func @transform_1(%arg0: i32, %arg1: i32) -> (i32, i32, i32) {
    %c0_i32 = arith.constant 0 : i32
    %c0_i32_0 = arith.constant 0 : i32
    return %arg0, %c0_i32, %arg1 : i32, i32, i32
  }
  func.func @transform_2(%arg0: i32, %arg1: i32) -> (i32, i32, i32) {
    %c0_i32 = arith.constant 0 : i32
    %c0_i32_0 = arith.constant 0 : i32
    return %arg0, %c0_i32, %arg1 : i32, i32, i32
  }
  func.func @transform_3(%arg0: i32, %arg1: i32) -> (i32, i32) {
    %c0_i32 = arith.constant 0 : i32
    %c0_i32_0 = arith.constant 0 : i32
    %c0_i32_1 = arith.constant 0 : i32
    return %c0_i32, %c0_i32_0 : i32, i32
  }
  func.func @transform_4(%arg0: i32, %arg1: i32) -> (i32, i32) {
    %c0_i32 = arith.constant 0 : i32
    %c0_i32_0 = arith.constant 0 : i32
    %c0_i32_1 = arith.constant 0 : i32
    return %c0_i32, %c0_i32_0 : i32, i32
  }
  func.func @transform_5(%arg0: i32, %arg1: i32) -> (i32, i32) {
    %c0_i32 = arith.constant 0 : i32
    %c0_i32_0 = arith.constant 0 : i32
    %c0_i32_1 = arith.constant 0 : i32
    return %c0_i32, %c0_i32_0 : i32, i32
  }
  func.func @transform_6(%arg0: i32, %arg1: i32) -> (i32, i32) {
    %c0_i32 = arith.constant 0 : i32
    %c0_i32_0 = arith.constant 0 : i32
    %c0_i32_1 = arith.constant 0 : i32
    return %c0_i32, %c0_i32_0 : i32, i32
  }
  func.func @transform_7(%arg0: i32, %arg1: i32) -> (i32, i32) {
    %c0_i32 = arith.constant 0 : i32
    %c0_i32_0 = arith.constant 0 : i32
    %c0_i32_1 = arith.constant 0 : i32
    return %c0_i32, %c0_i32_0 : i32, i32
  }
  func.func @transform_8(%arg0: i32, %arg1: i32) -> (i32, i32) {
    %c0_i32 = arith.constant 0 : i32
    %c0_i32_0 = arith.constant 0 : i32
    %c0_i32_1 = arith.constant 0 : i32
    return %c0_i32, %c0_i32_0 : i32, i32
  }
  func.func @transform_9(%arg0: i32, %arg1: i32) -> (i32, i32, i32) {
    %c0_i32 = arith.constant 0 : i32
    %c0_i32_0 = arith.constant 0 : i32
    return %arg0, %c0_i32, %arg1 : i32, i32, i32
  }
}

</mosaic_0001>

<bundles_post_ra>
// kernel: tpu_custom_call.1
= control target key start
LH: loop header
LB: loop body
LE: loop exit
PB: predicated region body
PF: predicated region fallthrough
CT: control target
= control target key end

     0   :  { %s3049_s0 = inlined_call_operand.vmem [shape: f32[2,64,256], index: 0, kind: input, shape index: {}]   ;;  %s3050_s1 = inlined_call_operand.hbm [shape: f32[2,64,256], index: 1, kind: input, shape index: {}]   ;;  %s3051_s2 = inlined_call_operand.hbm [shape: f32[2,64,256], index: 2, kind: input, shape index: {}]   ;;  %s3052_s3 = inlined_call_operand.vmem [shape: f32[8,64], index: 3, kind: input, shape index: {}]   ;;  %s3053_s4 = inlined_call_operand.vmem [shape: f32[8,64], index: 4, kind: input, shape index: {}]   ;;  %s3054_s5 = inlined_call_operand.vmem [shape: f32[8,64], index: 5, kind: input, shape index: {}]   ;;  %s3055_s6 = inlined_call_operand.vmem [shape: f32[8,1], index: 6, kind: input, shape index: {}]   ;;  %s3056_s7 = inlined_call_operand.vmem [shape: f32[192,8], index: 7, kind: input, shape index: {}]   ;;  %s3057_s8 = inlined_call_operand.vmem [shape: f32[192,1], index: 8, kind: input, shape index: {}]   ;;  %s3058_s9 = inlined_call_operand.hbm [shape: f32[2,64,256], index: 9, kind: output, shape index: {}]  }
   0x1   :  { %3065 = sst [smem:[#allocation16_spill]] %s3050_s1 }
   0x2   :  { %3066 = sst [smem:[#allocation17_spill]] %s3058_s9 }
   0x3   :  { %14 = vsyncpa [#allocation3], 0 }
   0x4   :  { %16 = vsyncpa [#allocation3 + $0x1], 0 }
   0x5   :  { %17 = vsyncpa [#allocation6], 0 }
   0x6   :  { %19 = vsyncpa [#allocation6 + $0x1], 0 }
   0x7   :  { %20 = vsyncpa [#allocation4], 0 }
   0x8   :  { %22 = vsyncpa [#allocation4 + $0x1], 0  ;;  %s2337_s30 = smov 0   ;;  %s2339_s10 = smov 0  }
   0x9   :  { %s2341_s11 = smov 0   ;;  %s2343_s12 = smov 0  }
   0xa   :  { %s2345_s13 = smov 0   ;;  %s2347_s14 = smov 0  }
   0xb LB: > { %3067 = sst [smem:[#allocation11_spill]] %s2256_s30  ;;  %s1719_s15 = sadd.s32 4294967295, %s2276_s14   ;;  %s2276_s14 = sphi %s2347_s14, %s28_s14   ;;  %s2272_s13 = sphi %s2345_s13, %s3089_s13   ;;  %s2268_s12 = sphi %s2343_s12, %s3088_s12   ;;  %s2264_s11 = sphi %s2341_s11, %s3084_s11   ;;  %s2260_s10 = sphi %s2339_s10, %s3087_s10   ;;  %s2256_s30 = sphi %s2337_s30, %s3086_s30  }
   0xc   : > { %3068 = sst [smem:[#allocation12_spill]] %s2264_s11  ;;  %s1720_s16 = sadd.s32 4294967294, %s2276_s14  }
   0xd   : > { %s40_s17 = sadd.s32 1, %s2272_s13  ;;  %s77_s18 = sadd.s32 1, %s2264_s11 }
   0xe   : > { %p42_p0 = scmp.ge.s32.totalorder %s40_s17, 2  ;;  %p84_p1 = scmp.ne.s32.totalorder %s2264_s11, %s2260_s10 }
   0xf   : > { %p85_p2 = scmp.eq.s32.totalorder %s2276_s14, 0  ;;  %p90_p3 = scmp.ne.s32.totalorder %s2260_s10, %s2256_s30 }
  0x10   : > { %s3091_s17 = smov (%p42_p0, %s40_s17), 0  ;;  %p91_p5 = scmp.eq.s32.totalorder %s1719_s15, 0 }
  0x11   : > { %3069 = sst [smem:[#allocation13_spill]] %s3091_s17  ;;  %p2378_p4 = por %p85_p2, %p84_p1 }
  0x12   : > { %s72_s20 = ssub.s32 %s2272_s13, %s3091_s17  ;;  %p270_p6 = scmp.eq.s32.totalorder %s1719_s15, 1 }
  0x13   : > { %p75_p7 = scmp.eq.s32.totalorder %s72_s20, 0  ;;  %p2384_p8 = por %p91_p5, %p90_p3 }
  0x14   : > { %p2388_p9 = por %p270_p6, %p84_p1  ;;  %p276_p10 = scmp.eq.s32.totalorder %s1720_s16, 1 }
  0x15   : > { %s2393_s23 = scalar_select %p75_p7, %s2264_s11, %s77_s18  }
  0x16   : > { %p2395_p11 = por %p276_p10, %p90_p3  ;;  %p1722_p12 = scmp.ge.s32.totalorder %s2276_s14, 2 }
  0x17   : > { %3073 = sst [smem:[#allocation14_spill]] %s2393_s23  ;;  %p1838_p13 = scmp.lt.s32.totalorder %s2276_s14, 2 }
  0x18   : > { %s3074_s24 = scalar_select %p2395_p11, 1, 0 }
  0x19   : > { %s2402_s25 = sand.u32 1, %s2264_s11   ;;  %s1815_s27 = sshll.u32 %s2272_s13, 11 }
  0x1a   : > { %3075 = sst [smem:[#allocation15_spill]] %s3074_s24  ;;  %s3060_s26 = sshll.u32 %s2402_s25, 7 }
  0x1b   : > { %s3076_s1 = sld [smem:[#allocation16_spill]]  ;;  %s331_s16 = scalar_lea.vmem [#allocation2], %s3060_s26 }
  0x1c   : > { %s340_s18 = sshll.u32 %s331_s16, 4  ;;  %p2415_p0 = pnand %p1838_p13, %p2378_p4  ;;  %s341_s18 = int_to_ptr.vmem [resolvable:$true] %s340_s18 }
  0x1d   : > { %p1729_p1 = scmp.ge.s32.totalorder %s2276_s14, 1  ;;  %s328_s17 = scalar_lea.sflag [#allocation3], %s2402_s25 }
  0x1e   : > { %p2138_p2 = pneg %p2415_p0  ;;  %s2149_s23 = scalar_lea.vmem %s341_s18, 2048 }
  0x1f   : > { %p2150_p3 = scmp.ne.s32.totalorder %s341_s18, %s2149_s23  ;;  %s2278_s28 = smov [#allocation2]  }
  0x20   : > { %s2154_s29 = sshll.u32 %s2278_s28, 4  ;;  %s2155_s29 = int_to_ptr.vmem [resolvable:$false] %s2154_s29 }
  0x21   : > { %s339_s15 = scalar_lea.hbm %s3076_s1, %s1815_s27  ;;  %p2152_p5 = pnand %p2150_p3, %p2138_p2 }
  0x22   : > { %s2156_s19 = scalar_lea.vmem %s2155_s29, 4096  ;;  %p2157_p4 = scmp.lt.s32.totalorder %s341_s18, %s2155_s29 }
  0x23   : > { %p2153_p6 = pneg %p2152_p5  ;;  %p2158_p7 = scmp.lt.s32.totalorder %s2156_s19, %s2149_s23 }
  0x25   : > { %p2159_p10 = por %p2158_p7, %p2157_p4 }
  0x27   : > { %p2160_p13 = pnand %p2159_p10, %p2153_p6 }
  0x29   : > { %2163 = shalt.err (!%p2160_p13)
}
  0x2a   : > { %s2279_s16 = smov 256   ;;  %s2280_s26 = smov 16  }
  0x2b   : > { %1830 = dma.hbm_to_vmem [thread:$0]  (!%p2415_p0), %s339_s15, 2048, %s341_s18, %s328_s17, %s2279_s16, %s2279_s16, %s2280_s26  }
  0x2c   : > { %p371_p3 = scmp.lt.s32.totalorder %s2276_s14, 3  ;;  %s362_s23 = scalar_lea.hbm %s3051_s2, %s1815_s27 }
  0x2d   : > { %s3079_s19 = sshll.u32 %s2402_s25, 7  ;;  %s351_s30 = scalar_lea.sflag [#allocation6], %s2402_s25 }
  0x2e   : > { %p2436_p5 = pnand %p1729_p1, %p371_p3  ;;  %s354_s11 = scalar_lea.vmem [#allocation5], %s3079_s19 }
  0x2f   : > { %s363_s24 = sshll.u32 %s354_s11, 4  ;;  %s2281_s17 = smov [#allocation5]   ;;  %s364_s24 = int_to_ptr.vmem [resolvable:$true] %s363_s24 }
  0x30   : > { %s2177_s9 = scalar_lea.vmem %s364_s24, 2048  ;;  %s2182_s15 = sshll.u32 %s2281_s17, 4  ;;  %s2183_s15 = int_to_ptr.vmem [resolvable:$false] %s2182_s15 }
  0x31   : > { %p2178_p6 = scmp.ne.s32.totalorder %s364_s24, %s2177_s9  ;;  %s2184_s1 = scalar_lea.vmem %s2183_s15, 4096 }
  0x32   : > { %p2185_p10 = scmp.lt.s32.totalorder %s364_s24, %s2183_s15  ;;  %p2186_p1 = scmp.lt.s32.totalorder %s2184_s1, %s2177_s9 }
  0x33   : > { %p2180_p4 = pnand %p2178_p6, %p2138_p2 }
  0x34   : > { %p2187_p13 = por %p2186_p1, %p2185_p10 }
  0x35   : > { %p2181_p7 = pneg %p2180_p4 }
  0x37   : > { %p2188_p3 = pnand %p2187_p13, %p2181_p7 }
  0x39   : > { %2191 = shalt.err (!%p2188_p3)
}
  0x3a   : > { %1833 = dma.hbm_to_vmem [thread:$0]  (!%p2415_p0), %s362_s23, 2048, %s364_s24, %s351_s30, %s2279_s16, %s2279_s16, %s2280_s26  }
  0x3b   : > { %375 = sbr.rel (%p2436_p5) target bundleno = 632 (0x278), region = 56  ;;  %s2451_s11 = sand.u32 (!%p2436_p5), 1, %s2260_s10  }
  0x3c   : > { %s2454_s25 = sshll.u32 (!%p2436_p5), %s2451_s11, 7  ;;  %s378_s27 = scalar_lea.sflag (!%p2436_p5), [#allocation3], %s2451_s11 }
  0x3d   : > { %s2458_s9 = scalar_lea.vmem (!%p2436_p5), [#allocation2], %s2454_s25 }
  0x40   : > { %2243 = dma.done.wait (%p2384_p8), %s378_s27, 2048  }
  0x41   : > { %2245 = vsyncadd (%p2384_p8), %s378_s27, 4294965248  ;;  %s387_s30 = scalar_lea.sflag [#allocation6], %s2451_s11  ;;  %s2466_s24 = scalar_lea.vmem [#allocation5], %s2454_s25 }
  0x42   : > { %2247 = dma.done.wait (%p2384_p8), %s387_s30, 2048  }
  0x43   : > { %2249 = vsyncadd (%p2384_p8), %s387_s30, 4294965248  ;;  %p440_p0 = scmp.lt.s32.totalorder %s2268_s12, 1  ;;  %v2282_v0 = vmov 0.0   ;;  %v2283_v1 = vmov 0   ;;  %v483_v2 = vld [vmem:[%s2458_s9 + $0x78] sm:$0xff]  ;;  %v482_v4 = vld [vmem:[%s2458_s9 + $0x70] sm:$0xff] }
  0x44   : > { %570 = vmatprep.mubr.f32.mxu0 %v2282_v0  ;;  %644 = vmatprep.mubr.f32.mxu1 %v2282_v0  ;;  %v481_v6 = vld [vmem:[%s2458_s9 + $0x68] sm:$0xff]  ;;  %v480_v8 = vld [vmem:[%s2458_s9 + $0x60] sm:$0xff]  ;;  %v479_v10 = vld [vmem:[%s2458_s9 + $0x58] sm:$0xff]  ;;  %vm502_vm0 = vcmask 523264   ;;  %vm906_vm1 = vcmask 64512   ;;  %s2940_s28 = scalar_lea.vmem [#allocation7], %s2454_s25 }
  0x45   : > { %s441_s26 = scalar_select %p440_p0, %s2268_s12, 1  ;;  %1894 = vset.pattern.permute.xlu0 %v2283_v1  ;;  %1895 = vset.pattern.permute.xlu1 %v2283_v1  ;;  %v478_v12 = vld [vmem:[%s2458_s9 + $0x50] sm:$0xff]  ;;  %v477_v14 = vld [vmem:[%s2458_s9 + $0x48] sm:$0xff]  ;;  %v476_v16 = vld [vmem:[%s2458_s9 + $0x40] sm:$0xff] }
  0x46   : > { %522 = vmatprep.subr.mxu0 %v483_v2  ;;  %v475_v18 = vld [vmem:[%s2458_s9 + $0x38] sm:$0xff]  ;;  %v474_v20 = vld [vmem:[%s2458_s9 + $0x30] sm:$0xff]  ;;  %v473_v22 = vld [vmem:[%s2458_s9 + $0x28] sm:$0xff]  ;;  %s1818_s25 = sshll.u32 %s2268_s12, 11  ;;  %s3080_s23 = sld [smem:[#allocation17_spill]] }
  0x47   : > { %s1817_s18 = sshll.u32 %s441_s26, 7  ;;  %523 = vmatpush1.msra.mxu0 %v482_v4  ;;  %v472_v24 = vld [vmem:[%s2458_s9 + $0x20] sm:$0xff]  ;;  %v471_v26 = vld [vmem:[%s2458_s9 + $0x18] sm:$0xff]  ;;  %v470_v28 = vld [vmem:[%s2458_s9 + $0x10] sm:$0xff]  ;;  %s1573_s19 = scalar_lea.sflag [#allocation4], %s2451_s11 }
  0x48   : > { %s2479_s16 = scalar_lea.vmem %s3049_s0, %s1817_s18  ;;  %524 = vmatprep.subr.mxu0 %v481_v6  ;;  %v469_v30 = vld [vmem:[%s2458_s9 + $0x8] sm:$0xff]  ;;  %v468_v32 = vld [vmem:[%s2458_s9] sm:$0xff]  ;;  %v499_v36 = vld [vmem:[%s2466_s24 + $0x78] sm:$0xff] }
  0x49   : > { %v467_v3 = vld [vmem:[%s2479_s16 + $0x78] sm:$0xff]  ;;  %v466_v5 = vld [vmem:[%s2479_s16 + $0x70] sm:$0xff]  ;;  %v465_v7 = vld [vmem:[%s2479_s16 + $0x68] sm:$0xff]  ;;  %525 = vmatpush1.msra.mxu0 %v480_v8 }
  0x4a   : > { %596 = vmatprep.subr.mxu1 %v467_v3  ;;  %v464_v9 = vld [vmem:[%s2479_s16 + $0x60] sm:$0xff]  ;;  %v463_v11 = vld [vmem:[%s2479_s16 + $0x58] sm:$0xff]  ;;  %v462_v13 = vld [vmem:[%s2479_s16 + $0x50] sm:$0xff]  ;;  %526 = vmatprep.subr.mxu0 %v479_v10 }
  0x4b   : > { %597 = vmatpush1.msra.mxu1 %v466_v5  ;;  %v461_v15 = vld [vmem:[%s2479_s16 + $0x48] sm:$0xff]  ;;  %v460_v17 = vld [vmem:[%s2479_s16 + $0x40] sm:$0xff]  ;;  %527 = vmatpush1.msra.mxu0 %v478_v12  ;;  %v459_v19 = vld [vmem:[%s2479_s16 + $0x38] sm:$0xff] }
  0x4c   : > { %598 = vmatprep.subr.mxu1 %v465_v7  ;;  %528 = vmatprep.subr.mxu0 %v477_v14  ;;  %v458_v21 = vld [vmem:[%s2479_s16 + $0x30] sm:$0xff]  ;;  %v457_v23 = vld [vmem:[%s2479_s16 + $0x28] sm:$0xff]  ;;  %v456_v25 = vld [vmem:[%s2479_s16 + $0x20] sm:$0xff]  ;;  %s2996_s29 = scalar_lea.hbm %s3080_s23, %s1818_s25 }
  0x4d   : > { %599 = vmatpush1.msra.mxu1 %v464_v9  ;;  %529 = vmatpush1.msra.mxu0 %v476_v16  ;;  %v455_v27 = vld [vmem:[%s2479_s16 + $0x18] sm:$0xff]  ;;  %v454_v29 = vld [vmem:[%s2479_s16 + $0x10] sm:$0xff]  ;;  %v453_v31 = vld [vmem:[%s2479_s16 + $0x8] sm:$0xff] }
  0x4e   : > { %600 = vmatprep.subr.mxu1 %v463_v11  ;;  %530 = vmatprep.subr.mxu0 %v475_v18  ;;  %v452_v33 = vld [vmem:[%s2479_s16] sm:$0xff]  ;;  %v498_v37 = vld [vmem:[%s2466_s24 + $0x70] sm:$0xff]  ;;  %v497_v38 = vld [vmem:[%s2466_s24 + $0x68] sm:$0xff] }
  0x4f   : > { %601 = vmatpush1.msra.mxu1 %v462_v13  ;;  %531 = vmatpush1.msra.mxu0 %v474_v20  ;;  %v501_v34 = vld [vmem:[%s3053_s4] sm:$0xff]  ;;  %v495_v41 = vld [vmem:[%s2466_s24 + $0x58] sm:$0xff]  ;;  %v494_v42 = vld [vmem:[%s2466_s24 + $0x50] sm:$0xff] }
  0x50   : > { %602 = vmatprep.subr.mxu1 %v461_v15  ;;  %532 = vmatprep.subr.mxu0 %v473_v22  ;;  %v500_v35 = vld [vmem:[%s3052_s3] sm:$0xff]  ;;  %v493_v44 = vld [vmem:[%s2466_s24 + $0x48] sm:$0xff]  ;;  %v491_v46 = vld [vmem:[%s2466_s24 + $0x38] sm:$0xff] }
  0x51   : > { %603 = vmatpush1.msra.mxu1 %v460_v17  ;;  %533 = vmatpush1.msra.mxu0 %v472_v24  ;;  %v728_v39 = vld [vmem:[%s3055_s6] sm:$0xff]  ;;  %v490_v47 = vld [vmem:[%s2466_s24 + $0x30] sm:$0xff]  ;;  %v765_v48 = vld [vmem:[%s3057_s8 + $0x18] sm:$0xff] }
  0x52   : > { %604 = vmatprep.subr.mxu1 %v459_v19  ;;  %534 = vmatprep.subr.mxu0 %v471_v26  ;;  %v496_v40 = vld [vmem:[%s2466_s24 + $0x60] sm:$0xff]  ;;  %v489_v49 = vld [vmem:[%s2466_s24 + $0x28] sm:$0xff]  ;;  %v487_v51 = vld [vmem:[%s2466_s24 + $0x18] sm:$0xff] }
  0x53   : > { %605 = vmatpush1.msra.mxu1 %v458_v21  ;;  %535 = vmatpush1.msra.mxu0 %v470_v28  ;;  %v762_v43 = vld [vmem:[%s3057_s8] sm:$0xff]  ;;  %v486_v52 = vld [vmem:[%s2466_s24 + $0x10] sm:$0xff]  ;;  %v767_v53 = vld [vmem:[%s3057_s8 + $0x28] sm:$0xff] }
  0x54   : > { %606 = vmatprep.subr.mxu1 %v457_v23  ;;  %536 = vmatprep.subr.mxu0 %v469_v30  ;;  %v492_v45 = vld [vmem:[%s2466_s24 + $0x40] sm:$0xff]  ;;  %v485_v54 = vld [vmem:[%s2466_s24 + $0x8] sm:$0xff]  ;;  %v769_v57 = vld [vmem:[%s3057_s8 + $0x38] sm:$0xff] }
  0x55   : > { %607 = vmatpush1.msra.mxu1 %v456_v25  ;;  %537 = vmatpush1.msra.mxu0 %v468_v32  ;;  %v488_v50 = vld [vmem:[%s2466_s24 + $0x20] sm:$0xff]  ;;  %v771_v58 = vld [vmem:[%s3057_s8 + $0x48] sm:$0xff]  ;;  %v773_v59 = vld [vmem:[%s3057_s8 + $0x58] sm:$0xff] }
  0x56   : > { %608 = vmatprep.subr.mxu1 %v455_v27  ;;  %1735 = vmatmul.mubr.msk.f32.vlgmr.msra.gmra.mxu0 %vm502_vm0, %v501_v34  ;;  %v484_v55 = vld [vmem:[%s2466_s24] sm:$0xff]  ;;  %v775_v60 = vld [vmem:[%s3057_s8 + $0x68] sm:$0xff]  ;;  %v777_v61 = vld [vmem:[%s3057_s8 + $0x78] sm:$0xff] }
  0x57   : > { %609 = vmatpush1.msra.mxu1 %v454_v29  ;;  %671 = vmatprep.subr.mxu0 %v499_v36  ;;  %v651_v56 = vld [vmem:[%s3054_s5] sm:$0xff]  ;;  %v779_v62 = vld [vmem:[%s3057_s8 + $0x88] sm:$0xff]  ;;  %v781_v63 = vld [vmem:[%s3057_s8 + $0x98] sm:$0xff] }
  0x58   : > { %610 = vmatprep.subr.mxu1 %v453_v31  ;;  %719 = vmatprep.mubr.f32.mxu0 %v2282_v0  ;;  %v783_v1 = vld [vmem:[%s3057_s8 + $0xa8] sm:$0xff]  ;;  %v785_v2 = vld [vmem:[%s3057_s8 + $0xb8] sm:$0xff]  ;;  %v764_v4 = vld [vmem:[%s3057_s8 + $0x10] sm:$0xff] }
  0x59   : > { %611 = vmatpush1.msra.mxu1 %v452_v33  ;;  %672 = vmatpush1.msra.mxu0 %v498_v37  ;;  %v763_v3 = vld [vmem:[%s3057_s8 + $0x8] sm:$0xff]  ;;  %v766_v5 = vld [vmem:[%s3057_s8 + $0x20] sm:$0xff]  ;;  %v768_v6 = vld [vmem:[%s3057_s8 + $0x30] sm:$0xff] }
  0x5a   : > { %1736 = vmatmul.mubr.msk.f32.vlgmr.msra.gmra.mxu1 %vm502_vm0, %v500_v35  ;;  %731 = vperm.xlu0 %1894, %v728_v39   ;;  %v770_v7 = vld [vmem:[%s3057_s8 + $0x40] sm:$0xff]  ;;  %v772_v8 = vld [vmem:[%s3057_s8 + $0x50] sm:$0xff]  ;;  %v739_v32 = vld [vmem:[%s3056_s7 + $0x8] sm:$0xff] }
  0x5b   : > { %673 = vmatprep.subr.mxu0 %v497_v38  ;;  %1103 = vmatprep.mubr.f32.mxu1 %v2282_v0  ;;  %v774_v9 = vld [vmem:[%s3057_s8 + $0x60] sm:$0xff]  ;;  %v776_v10 = vld [vmem:[%s3057_s8 + $0x70] sm:$0xff]  ;;  %v749_v33 = vld [vmem:[%s3056_s7 + $0x58] sm:$0xff] }
  0x5c   : > { %674 = vmatpush1.msra.mxu0 %v496_v40  ;;  %793 = vperm.xlu1 %1895, %v763_v3   ;;  %v778_v11 = vld [vmem:[%s3057_s8 + $0x80] sm:$0xff]  ;;  %v780_v12 = vld [vmem:[%s3057_s8 + $0x90] sm:$0xff]  ;;  %v741_v36 = vld [vmem:[%s3056_s7 + $0x18] sm:$0xff] }
  0x5d   : > { %675 = vmatprep.subr.mxu0 %v495_v41  ;;  %v782_v13 = vld [vmem:[%s3057_s8 + $0xa0] sm:$0xff]  ;;  %v784_v14 = vld [vmem:[%s3057_s8 + $0xb0] sm:$0xff]  ;;  %v751_v37 = vld [vmem:[%s3056_s7 + $0x68] sm:$0xff] }
  0x5e   : > { %676 = vmatpush1.msra.mxu0 %v494_v42  ;;  %788 = vperm.xlu0 %1894, %v762_v43   ;;  %v738_v30 = vld [vmem:[%s3056_s7] sm:$0xff]  ;;  %v748_v31 = vld [vmem:[%s3056_s7 + $0x50] sm:$0xff]  ;;  %v743_v40 = vld [vmem:[%s3056_s7 + $0x28] sm:$0xff] }
  0x5f   : > { %677 = vmatprep.subr.mxu0 %v493_v44  ;;  %v740_v34 = vld [vmem:[%s3056_s7 + $0x10] sm:$0xff]  ;;  %v750_v35 = vld [vmem:[%s3056_s7 + $0x60] sm:$0xff]  ;;  %v753_v41 = vld [vmem:[%s3056_s7 + $0x78] sm:$0xff] }
  0x60   : > { %678 = vmatpush1.msra.mxu0 %v492_v45  ;;  %798 = vperm.xlu1 %1895, %v764_v4   ;;  %v742_v38 = vld [vmem:[%s3056_s7 + $0x20] sm:$0xff]  ;;  %v752_v39 = vld [vmem:[%s3056_s7 + $0x70] sm:$0xff]  ;;  %v745_v44 = vld [vmem:[%s3056_s7 + $0x38] sm:$0xff] }
  0x61   : > { %679 = vmatprep.subr.mxu0 %v491_v46  ;;  %v744_v42 = vld [vmem:[%s3056_s7 + $0x30] sm:$0xff]  ;;  %v754_v43 = vld [vmem:[%s3056_s7 + $0x80] sm:$0xff]  ;;  %v755_v45 = vld [vmem:[%s3056_s7 + $0x88] sm:$0xff] }
  0x62   : > { %680 = vmatpush1.msra.mxu0 %v490_v47  ;;  %803 = vperm.xlu0 %1894, %v765_v48   ;;  %v746_v46 = vld [vmem:[%s3056_s7 + $0x40] sm:$0xff]  ;;  %v756_v47 = vld [vmem:[%s3056_s7 + $0x90] sm:$0xff]  ;;  %v747_v48 = vld [vmem:[%s3056_s7 + $0x48] sm:$0xff] }
  0x63   : > { %681 = vmatprep.subr.mxu0 %v489_v49  ;;  %v757_v49 = vld [vmem:[%s3056_s7 + $0x98] sm:$0xff] }
  0x64   : > { %682 = vmatpush1.msra.mxu0 %v488_v50  ;;  %808 = vperm.xlu1 %1895, %v766_v5   ;;  %v758_v50 = vld [vmem:[%s3056_s7 + $0xa0] sm:$0xff] }
  0x65   : > { %683 = vmatprep.subr.mxu0 %v487_v51  ;;  %v759_v51 = vld [vmem:[%s3056_s7 + $0xa8] sm:$0xff] }
  0x66   : > { %684 = vmatpush1.msra.mxu0 %v486_v52  ;;  %813 = vperm.xlu0 %1894, %v767_v53   ;;  %v760_v52 = vld [vmem:[%s3056_s7 + $0xb0] sm:$0xff]  ;;  %v761_v53 = vld [vmem:[%s3056_s7 + $0xb8] sm:$0xff] }
  0x67   : > { %685 = vmatprep.subr.mxu0 %v485_v54 }
  0x68   : > { %686 = vmatpush1.msra.mxu0 %v484_v55  ;;  %818 = vperm.xlu1 %1895, %v768_v6  }
  0x69   : > { %1737 = vmatmul.mubr.msk.f32.vlgmr.msra.gmra.mxu0 %vm502_vm0, %v651_v56 }
  0x6a   : > { %823 = vperm.xlu0 %1894, %v769_v57   ;;  %1043 = vmatprep.mubr.f32.mxu0 %v2282_v0 }
  0x6c   : > { %828 = vperm.xlu1 %1895, %v770_v7  }
  0x6e   : > { %833 = vperm.xlu0 %1894, %v771_v58  }
  0x70   : > { %838 = vperm.xlu1 %1895, %v772_v8  }
  0x72   : > { %843 = vperm.xlu0 %1894, %v773_v59  }
  0x74   : > { %848 = vperm.xlu1 %1895, %v774_v9  }
  0x76   : > { %853 = vperm.xlu0 %1894, %v775_v60  }
  0x78   : > { %858 = vperm.xlu1 %1895, %v776_v10  }
  0x7a   : > { %863 = vperm.xlu0 %1894, %v777_v61  }
  0x7c   : > { %868 = vperm.xlu1 %1895, %v778_v11  }
  0x7e   : > { %873 = vperm.xlu0 %1894, %v779_v62  }
  0x80   : > { %878 = vperm.xlu1 %1895, %v780_v12  }
  0x82   : > { %883 = vperm.xlu0 %1894, %v781_v63  }
  0x84   : > { %888 = vperm.xlu1 %1895, %v782_v13  }
  0x86   : > { %893 = vperm.xlu0 %1894, %v783_v1  }
  0x88   : > { %898 = vperm.xlu1 %1895, %v784_v14  }
  0x8a   : > { %903 = vperm.xlu0 %1894, %v785_v2  }
  0xd5   : > { %v732_v24 = vpop.permute.xlu0 %731 }
  0xd7   : > { %v794_v54 = vpop.permute.xlu1 %793 }
  0xd9   : > { %v789_v55 = vpop.permute.xlu0 %788 }
  0xdb   : > { %v799_v56 = vpop.permute.xlu1 %798 }
  0xdd   : > { %v2737_v57 = vpop.permute.xlu0 %803 }
  0xdf   : > { %v2739_v58 = vpop.permute.xlu1 %808 }
  0xe1   : > { %v2741_v59 = vpop.permute.xlu0 %813 }
  0xe3   : > { %v2743_v60 = vpop.permute.xlu1 %818 }
  0xe5   : > { %v2745_v61 = vpop.permute.xlu0 %823 }
  0xe9   : > { %v2749_v62 = vpop.permute.xlu0 %833 }
  0xed   : > { %v844_v13 = vpop.permute.xlu0 %843 }
 0x116   : > { %v572_v15 = vpop.f32.mrf.mxu0 }
 0x118   : > { %v574_v17 = vpop.f32.mrf.mxu0 }
 0x11a   : > { %v646_v16 = vpop.f32.mrf.mxu1 }
 0x11b   : > { %v647_v19 = vadd.f32 %v646_v16, %v572_v15 }
 0x11c   : > { %v648_v18 = vpop.f32.mrf.mxu1 }
 0x11d   : > { %v649_v21 = vadd.f32 %v648_v18, %v574_v17 }
 0x129   : > { %v721_v20 = vpop.f32.mrf.mxu0 }
 0x12a   : > { %v726_v22 = vadd.f32 %v721_v20, %v647_v19 }
 0x12b   : > { %v723_v23 = vpop.f32.mrf.mxu0 }
 0x12c   : > { %v727_v25 = vadd.f32 %v723_v23, %v649_v21  ;;  %v734_v26 = vadd.f32 %v732_v24, %v726_v22 }
 0x12e   : > { %v735_v27 = vadd.f32 %v732_v24, %v727_v25  ;;  %v736_v29 = vmax.f32 %v734_v26, 0.0 }
 0x130   : > { %v737_v28 = vmax.f32 %v735_v27, 0.0 }
 0x132   : > { %1009 = vmatprep.subr.mxu0 %v737_v28  ;;  %1819 = vmatprep.subr.mxu1 %v737_v28 }
 0x133   : > { %1010 = vmatpush1.msra.mxu0 %v736_v29  ;;  %1820 = vmatpush1.msra.mxu1 %v736_v29 }
 0x134   : > { %1738 = vmatmul.mubr.msk.f32.vlgmr.msra.gmra.mxu0 %vm906_vm1, %v738_v30  ;;  %1748 = vmatmul.mubr.msk.f32.vlgmr.msra.gmra.mxu1 %vm906_vm1, %v748_v31 }
 0x135   : > { %1049 = vmatprep.mubr.f32.mxu0 %v2282_v0  ;;  %1109 = vmatprep.mubr.f32.mxu1 %v2282_v0 }
 0x138   : > { %1739 = vmatmul.mubr.msk.f32.gmra.mxu0 %vm906_vm1, %v739_v32  ;;  %1749 = vmatmul.mubr.msk.f32.gmra.mxu1 %vm906_vm1, %v749_v33 }
 0x139   : > { %1055 = vmatprep.mubr.f32.mxu0 %v2282_v0  ;;  %1115 = vmatprep.mubr.f32.mxu1 %v2282_v0 }
 0x13c   : > { %1740 = vmatmul.mubr.msk.f32.gmra.mxu0 %vm906_vm1, %v740_v34  ;;  %1750 = vmatmul.mubr.msk.f32.gmra.mxu1 %vm906_vm1, %v750_v35 }
 0x13d   : > { %1061 = vmatprep.mubr.f32.mxu0 %v2282_v0  ;;  %1121 = vmatprep.mubr.f32.mxu1 %v2282_v0 }
 0x140   : > { %1741 = vmatmul.mubr.msk.f32.gmra.mxu0 %vm906_vm1, %v741_v36  ;;  %1751 = vmatmul.mubr.msk.f32.gmra.mxu1 %vm906_vm1, %v751_v37 }
 0x141   : > { %1067 = vmatprep.mubr.f32.mxu0 %v2282_v0  ;;  %1127 = vmatprep.mubr.f32.mxu1 %v2282_v0 }
 0x144   : > { %1742 = vmatmul.mubr.msk.f32.gmra.mxu0 %vm906_vm1, %v742_v38  ;;  %1752 = vmatmul.mubr.msk.f32.gmra.mxu1 %vm906_vm1, %v752_v39  ;;  %v854_v39 = vpop.permute.xlu0 %853 }
 0x145   : > { %1073 = vmatprep.mubr.f32.mxu0 %v2282_v0  ;;  %1133 = vmatprep.mubr.f32.mxu1 %v2282_v0 }
 0x148   : > { %1743 = vmatmul.mubr.msk.f32.gmra.mxu0 %vm906_vm1, %v743_v40  ;;  %1753 = vmatmul.mubr.msk.f32.gmra.mxu1 %vm906_vm1, %v753_v41 }
 0x149   : > { %1079 = vmatprep.mubr.f32.mxu0 %v2282_v0  ;;  %1139 = vmatprep.mubr.f32.mxu1 %v2282_v0 }
 0x14c   : > { %1744 = vmatmul.mubr.msk.f32.gmra.mxu0 %vm906_vm1, %v744_v42  ;;  %1754 = vmatmul.mubr.msk.f32.gmra.mxu1 %vm906_vm1, %v754_v43 }
 0x14d   : > { %1085 = vmatprep.mubr.f32.mxu0 %v2282_v0  ;;  %1145 = vmatprep.mubr.f32.mxu1 %v2282_v0 }
 0x150   : > { %1745 = vmatmul.mubr.msk.f32.gmra.mxu0 %vm906_vm1, %v745_v44  ;;  %1755 = vmatmul.mubr.msk.f32.gmra.mxu1 %vm906_vm1, %v755_v45 }
 0x151   : > { %1091 = vmatprep.mubr.f32.mxu0 %v2282_v0  ;;  %1151 = vmatprep.mubr.f32.mxu1 %v2282_v0 }
 0x154   : > { %1746 = vmatmul.mubr.msk.f32.gmra.mxu0 %vm906_vm1, %v746_v46  ;;  %1756 = vmatmul.mubr.msk.f32.gmra.mxu1 %vm906_vm1, %v756_v47 }
 0x155   : > { %1097 = vmatprep.mubr.f32.mxu0 %v2282_v0  ;;  %1157 = vmatprep.mubr.f32.mxu1 %v2282_v0 }
 0x158   : > { %1747 = vmatmul.mubr.msk.f32.gmra.mxu0 %vm906_vm1, %v747_v48  ;;  %1757 = vmatmul.mubr.msk.f32.gmra.mxu1 %vm906_vm1, %v757_v49 }
 0x159   : > { %1163 = vmatprep.mubr.f32.mxu1 %v2282_v0 }
 0x15c   : > { %1758 = vmatmul.mubr.msk.f32.gmra.mxu1 %vm906_vm1, %v758_v50 }
 0x15d   : > { %1169 = vmatprep.mubr.f32.mxu1 %v2282_v0 }
 0x160   : > { %1759 = vmatmul.mubr.msk.f32.gmra.mxu1 %vm906_vm1, %v759_v51 }
 0x161   : > { %1175 = vmatprep.mubr.f32.mxu1 %v2282_v0 }
 0x164   : > { %1760 = vmatmul.mubr.msk.f32.gmra.mxu1 %vm906_vm1, %v760_v52 }
 0x165   : > { %1181 = vmatprep.mubr.f32.mxu1 %v2282_v0  ;;  %v2747_v0 = vpop.permute.xlu1 %828 }
 0x168   : > { %1761 = vmatmul.mubr.msk.f32.gmra.mxu1 %vm906_vm1, %v761_v53 }
 0x169   : > { %v839_v63 = vpop.permute.xlu1 %838 }
 0x16d   : > { %v849_v26 = vpop.permute.xlu1 %848 }
 0x1f4   : > { %v1045_v1 = vpop.f32.mrf.mxu0  ;;  %v1105_v2 = vpop.f32.mrf.mxu1 }
 0x1f5   : > { %v1046_v3 = vadd.f32 %v1045_v1, %v789_v55  ;;  %v1106_v4 = vadd.f32 %v1105_v2, %v839_v63 }
 0x1f6   : > { %v1047_v5 = vpop.f32.mrf.mxu0  ;;  %v1107_v6 = vpop.f32.mrf.mxu1 }
 0x1f7   : > { %v1762_v7 = vmul.f32 -1.442695, %v1046_v3  ;;  %v1782_v8 = vmul.f32 -1.442695, %v1106_v4  ;;  %v1048_v9 = vadd.f32 %v1047_v5, %v789_v55  ;;  %v1108_v10 = vadd.f32 %v1107_v6, %v839_v63 }
 0x1f8   : > { %v1051_v11 = vpop.f32.mrf.mxu0  ;;  %v1111_v12 = vpop.f32.mrf.mxu1 }
 0x1f9   : > { %1896 = vpow2.f32 %v1762_v7  ;;  %v1763_v14 = vmul.f32 -1.442695, %v1048_v9  ;;  %v1783_v15 = vmul.f32 -1.442695, %v1108_v10  ;;  %v1052_v16 = vadd.f32 %v1051_v11, %v794_v54 }
 0x1fa   : > { %1898 = vpow2.f32 %v1782_v8  ;;  %v1112_v17 = vadd.f32 %v1111_v12, %v844_v13  ;;  %v1053_v18 = vpop.f32.mrf.mxu0  ;;  %v1113_v19 = vpop.f32.mrf.mxu1 }
 0x1fb   : > { %1900 = vpow2.f32 %v1763_v14  ;;  %v1764_v20 = vmul.f32 -1.442695, %v1052_v16  ;;  %v1054_v21 = vadd.f32 %v1053_v18, %v794_v54  ;;  %v1114_v22 = vadd.f32 %v1113_v19, %v844_v13 }
 0x1fc   : > { %1902 = vpow2.f32 %v1783_v15  ;;  %v1784_v23 = vmul.f32 -1.442695, %v1112_v17  ;;  %v1057_v24 = vpop.f32.mrf.mxu0  ;;  %v1117_v25 = vpop.f32.mrf.mxu1 }
 0x1fd   : > { %1904 = vpow2.f32 %v1764_v20  ;;  %v1765_v27 = vmul.f32 -1.442695, %v1054_v21  ;;  %v1785_v28 = vmul.f32 -1.442695, %v1114_v22  ;;  %v1058_v29 = vadd.f32 %v1057_v24, %v799_v56 }
 0x1fe   : > { %1906 = vpow2.f32 %v1784_v23  ;;  %v1118_v30 = vadd.f32 %v1117_v25, %v849_v26  ;;  %v1059_v31 = vpop.f32.mrf.mxu0  ;;  %v1119_v32 = vpop.f32.mrf.mxu1 }
 0x1ff   : > { %1908 = vpow2.f32 %v1765_v27  ;;  %v1766_v33 = vmul.f32 -1.442695, %v1058_v29  ;;  %v1060_v34 = vadd.f32 %v1059_v31, %v799_v56  ;;  %v1120_v35 = vadd.f32 %v1119_v32, %v849_v26 }
 0x200   : > { %1910 = vpow2.f32 %v1785_v28  ;;  %v1786_v36 = vmul.f32 -1.442695, %v1118_v30  ;;  %v1063_v37 = vpop.f32.mrf.mxu0  ;;  %v1123_v38 = vpop.f32.mrf.mxu1 }
 0x201   : > { %1912 = vpow2.f32 %v1766_v33  ;;  %v1767_v40 = vmul.f32 -1.442695, %v1060_v34  ;;  %v1787_v41 = vmul.f32 -1.442695, %v1120_v35  ;;  %v1064_v42 = vadd.f32 %v1063_v37, %v2737_v57  ;;  %v859_v28 = vpop.permute.xlu1 %858 }
 0x202   : > { %1914 = vpow2.f32 %v1786_v36  ;;  %v1124_v43 = vadd.f32 %v1123_v38, %v854_v39  ;;  %v1065_v44 = vpop.f32.mrf.mxu0  ;;  %v1125_v45 = vpop.f32.mrf.mxu1 }
 0x203   : > { %1916 = vpow2.f32 %v1767_v40  ;;  %v1768_v46 = vmul.f32 -1.442695, %v1064_v42  ;;  %v1066_v47 = vadd.f32 %v1065_v44, %v2737_v57  ;;  %v1126_v48 = vadd.f32 %v1125_v45, %v854_v39  ;;  %v864_v44 = vpop.permute.xlu0 %863 }
 0x204   : > { %1918 = vpow2.f32 %v1787_v41  ;;  %v1788_v49 = vmul.f32 -1.442695, %v1124_v43  ;;  %v1069_v50 = vpop.f32.mrf.mxu0  ;;  %v1129_v51 = vpop.f32.mrf.mxu1 }
 0x205   : > { %1920 = vpow2.f32 %v1768_v46  ;;  %v1769_v52 = vmul.f32 -1.442695, %v1066_v47  ;;  %v1789_v53 = vmul.f32 -1.442695, %v1126_v48  ;;  %v1070_v30 = vadd.f32 %v1069_v50, %v2739_v58 }
 0x206   : > { %v1897_v54 = vpop.eup %1896  ;;  %1922 = vpow2.f32 %v1788_v49  ;;  %v1071_v55 = vpop.f32.mrf.mxu0  ;;  %v1130_v33 = vadd.f32 %v1129_v51, %v859_v28 }
 0x207   : > { %v1131_v56 = vpop.f32.mrf.mxu1  ;;  %v1899_v63 = vpop.eup %1898  ;;  %v1332_v1 = vadd.f32 1.0, %v1897_v54  ;;  %1924 = vpow2.f32 %v1769_v52  ;;  %v1072_v37 = vadd.f32 %v1071_v55, %v2739_v58  ;;  %v1770_v46 = vmul.f32 -1.442695, %v1070_v30 }
 0x208   : > { %v1901_v2 = vpop.eup %1900  ;;  %v1352_v3 = vadd.f32 1.0, %v1899_v63  ;;  %1926 = vpow2.f32 %v1789_v53  ;;  %v1075_v4 = vpop.f32.mrf.mxu0  ;;  %v1132_v40 = vadd.f32 %v1131_v56, %v859_v28  ;;  %v1790_v50 = vmul.f32 -1.442695, %v1130_v33 }
 0x209   : > { %v1135_v57 = vpop.f32.mrf.mxu1  ;;  %v1903_v5 = vpop.eup %1902  ;;  %1928 = vrcp.f32 %v1332_v1  ;;  %v1333_v6 = vadd.f32 1.0, %v1901_v2  ;;  %v1076_v47 = vadd.f32 %v1075_v4, %v2741_v59  ;;  %v1771_v53 = vmul.f32 -1.442695, %v1072_v37 }
 0x20a   : > { %v1905_v7 = vpop.eup %1904  ;;  %1930 = vrcp.f32 %v1352_v3  ;;  %v1353_v8 = vadd.f32 1.0, %v1903_v5  ;;  %v1077_v14 = vpop.f32.mrf.mxu0  ;;  %v1136_v58 = vadd.f32 %v1135_v57, %v864_v44  ;;  %v1791_v56 = vmul.f32 -1.442695, %v1132_v40 }
 0x20b   : > { %v2753_v9 = vpop.f32.mrf.mxu1  ;;  %v1907_v10 = vpop.eup %1906  ;;  %1932 = vrcp.f32 %v1333_v6  ;;  %v1334_v11 = vadd.f32 1.0, %v1905_v7  ;;  %v1078_v54 = vadd.f32 %v1077_v14, %v2741_v59  ;;  %v1772_v4 = vmul.f32 -1.442695, %v1076_v47 }
 0x20c   : > { %v1909_v12 = vpop.eup %1908  ;;  %1934 = vrcp.f32 %v1353_v8  ;;  %v1354_v13 = vadd.f32 1.0, %v1907_v10  ;;  %v1081_v25 = vpop.f32.mrf.mxu0  ;;  %v1138_v63 = vadd.f32 %v2753_v9, %v864_v44  ;;  %v1792_v59 = vmul.f32 -1.442695, %v1136_v58 }
 0x20d   : > { %v2755_v15 = vpop.f32.mrf.mxu1  ;;  %v1911_v16 = vpop.eup %1910  ;;  %1936 = vrcp.f32 %v1334_v11  ;;  %v1335_v17 = vadd.f32 1.0, %v1909_v12  ;;  %v1082_v57 = vadd.f32 %v1081_v25, %v2743_v60  ;;  %v1773_v9 = vmul.f32 -1.442695, %v1078_v54 }
 0x20e   : > { %v1913_v18 = vpop.eup %1912  ;;  %1938 = vrcp.f32 %v1354_v13  ;;  %v1355_v19 = vadd.f32 1.0, %v1911_v16  ;;  %v1083_v41 = vpop.f32.mrf.mxu0  ;;  %v1793_v12 = vmul.f32 -1.442695, %v1138_v63 }
 0x20f   : > { %v2757_v20 = vpop.f32.mrf.mxu1  ;;  %v1915_v21 = vpop.eup %1914  ;;  %1940 = vrcp.f32 %v1335_v17  ;;  %v1336_v22 = vadd.f32 1.0, %v1913_v18  ;;  %v1084_v10 = vadd.f32 %v1083_v41, %v2743_v60  ;;  %v1774_v18 = vmul.f32 -1.442695, %v1082_v57 }
 0x210   : > { %v1917_v23 = vpop.eup %1916  ;;  %1942 = vrcp.f32 %v1355_v19  ;;  %v1356_v24 = vadd.f32 1.0, %v1915_v21  ;;  %v1087_v1 = vpop.f32.mrf.mxu0 }
 0x211   : > { %v2759_v26 = vpop.f32.mrf.mxu1  ;;  %v1919_v27 = vpop.eup %1918  ;;  %1944 = vrcp.f32 %v1336_v22  ;;  %v1337_v29 = vadd.f32 1.0, %v1917_v23 }
 0x212   : > { %v1921_v31 = vpop.eup %1920  ;;  %1946 = vrcp.f32 %v1356_v24  ;;  %v1357_v32 = vadd.f32 1.0, %v1919_v27  ;;  %v869_v3 = vpop.permute.xlu1 %868 }
 0x213   : > { %v2762_v34 = vpop.f32.mrf.mxu1  ;;  %v1923_v35 = vpop.eup %1922  ;;  %1948 = vrcp.f32 %v1337_v29  ;;  %v1338_v36 = vadd.f32 1.0, %v1921_v31  ;;  %v1142_v7 = vadd.f32 %v2755_v15, %v869_v3  ;;  %v1144_v13 = vadd.f32 %v2757_v20, %v869_v3 }
 0x214   : > { %v1925_v38 = vpop.eup %1924  ;;  %1950 = vrcp.f32 %v1357_v32  ;;  %v1358_v39 = vadd.f32 1.0, %v1923_v35  ;;  %v1089_v14 = vpop.f32.mrf.mxu0  ;;  %v1088_v15 = vadd.f32 %v1087_v1, %v2745_v61  ;;  %v1775_v20 = vmul.f32 -1.442695, %v1084_v10 }
 0x215   : > { %v2765_v42 = vpop.f32.mrf.mxu1  ;;  %v1927_v43 = vpop.eup %1926  ;;  %1952 = vrcp.f32 %v1338_v36  ;;  %v1339_v45 = vadd.f32 1.0, %v1925_v38  ;;  %v1794_v60 = vmul.f32 -1.442695, %v1142_v7  ;;  %v1090_v24 = vadd.f32 %v1089_v14, %v2745_v61 }
 0x216   : > { %v2768_v48 = vpop.eup %1928  ;;  %1954 = vrcp.f32 %v1358_v39  ;;  %v1359_v49 = vadd.f32 1.0, %v1927_v43  ;;  %v874_v17 = vpop.permute.xlu0 %873  ;;  %v1795_v27 = vmul.f32 -1.442695, %v1144_v13  ;;  %v1776_v30 = vmul.f32 -1.442695, %v1088_v15 }
 0x217   : > { %v2770_v51 = vpop.f32.mrf.mxu1  ;;  %v2772_v52 = vpop.eup %1930  ;;  %1956 = vrcp.f32 %v1339_v45  ;;  %v1148_v22 = vadd.f32 %v2759_v26, %v874_v17  ;;  %v1150_v28 = vadd.f32 %v2762_v34, %v874_v17  ;;  %v1777_v61 = vmul.f32 -1.442695, %v1090_v24 }
 0x218   : > { %v2775_v55 = vpop.eup %1932  ;;  %1958 = vrcp.f32 %v1359_v49  ;;  %v1093_v44 = vpop.f32.mrf.mxu0 }
 0x219   : > { %v2778_v2 = vpop.eup %1934  ;;  %1960 = vpow2.f32 %v1770_v46  ;;  %v2781_v5 = vpop.f32.mrf.mxu1  ;;  %v1796_v26 = vmul.f32 -1.442695, %v1148_v22  ;;  %v1797_v36 = vmul.f32 -1.442695, %v1150_v28  ;;  %v1094_v15 = vadd.f32 %v1093_v44, %v2747_v0 }
 0x21a   : > { %v2783_v6 = vpop.eup %1936  ;;  %1962 = vpow2.f32 %v1790_v50  ;;  %v1095_v63 = vpop.f32.mrf.mxu0 }
 0x21b   : > { %v2786_v8 = vpop.eup %1938  ;;  %1964 = vpow2.f32 %v1771_v53  ;;  %v2795_v19 = vpop.f32.mrf.mxu1 }
 0x21c   : > { %v2789_v11 = vpop.eup %1940  ;;  %1966 = vpow2.f32 %v1791_v56  ;;  %v1099_v14 = vpop.f32.mrf.mxu0 }
 0x21d   : > { %v2792_v16 = vpop.eup %1942  ;;  %1968 = vpow2.f32 %v1772_v4  ;;  %v2808_v31 = vpop.f32.mrf.mxu1  ;;  %v1100_v44 = vadd.f32 %v1099_v14, %v2749_v62 }
 0x21e   : > { %v2797_v21 = vpop.eup %1944  ;;  %1970 = vpow2.f32 %v1792_v59 }
 0x21f   : > { %v2800_v23 = vpop.eup %1946  ;;  %1972 = vpow2.f32 %v1773_v9  ;;  %v2818_v34 = vpop.f32.mrf.mxu1 }
 0x220   : > { %v2803_v25 = vpop.eup %1948  ;;  %1974 = vpow2.f32 %v1793_v12  ;;  %v879_v12 = vpop.permute.xlu1 %878 }
 0x221   : > { %v2806_v29 = vpop.eup %1950  ;;  %1976 = vpow2.f32 %v1774_v18  ;;  %v2820_v47 = vpop.f32.mrf.mxu1 }
 0x222   : > { %v2810_v32 = vpop.eup %1952  ;;  %1978 = vpow2.f32 %v1794_v60 }
 0x223   : > { %v2812_v33 = vpop.eup %1954  ;;  %1980 = vpow2.f32 %v1775_v20  ;;  %v2822_v4 = vpop.f32.mrf.mxu1 }
 0x224   : > { %v2814_v35 = vpop.eup %1956  ;;  %1982 = vpow2.f32 %v1795_v27  ;;  %v884_v20 = vpop.permute.xlu0 %883  ;;  %v1154_v27 = vadd.f32 %v2765_v42, %v879_v12 }
 0x225   : > { %v2816_v37 = vpop.eup %1958  ;;  %1984 = vpow2.f32 %v1776_v30  ;;  %v1177_v60 = vpop.f32.mrf.mxu1 }
 0x226   : > { %v1961_v38 = vpop.eup %1960  ;;  %1986 = vpow2.f32 %v1796_v26  ;;  %v1096_v26 = vadd.f32 %v1095_v63, %v2747_v0  ;;  %v889_v42 = vpop.permute.xlu1 %888  ;;  %v1160_v0 = vadd.f32 %v2781_v5, %v884_v20 }
 0x227   : > { %v1963_v39 = vpop.eup %1962  ;;  %v1340_v40 = vadd.f32 1.0, %v1961_v38  ;;  %1988 = vpow2.f32 %v1777_v61  ;;  %v1156_v38 = vadd.f32 %v2770_v51, %v879_v12 }
 0x228   : > { %v1965_v41 = vpop.eup %1964  ;;  %v1360_v43 = vadd.f32 1.0, %v1963_v39  ;;  %1990 = vpow2.f32 %v1797_v36  ;;  %v1101_v39 = vpop.f32.mrf.mxu0  ;;  %v1779_v51 = vmul.f32 -1.442695, %v1096_v26 }
 0x229   : > { %v1967_v45 = vpop.eup %1966  ;;  %1992 = vrcp.f32 %v1340_v40  ;;  %v1341_v46 = vadd.f32 1.0, %v1965_v41  ;;  %v1799_v63 = vmul.f32 -1.442695, %v1156_v38 }
 0x22a   : > { %v1969_v49 = vpop.eup %1968  ;;  %1994 = vrcp.f32 %v1360_v43  ;;  %v1361_v50 = vadd.f32 1.0, %v1967_v45  ;;  %v1778_v43 = vmul.f32 -1.442695, %v1094_v15  ;;  %v1179_v45 = vpop.f32.mrf.mxu1 }
 0x22b   : > { %v1971_v58 = vpop.eup %1970  ;;  %1996 = vrcp.f32 %v1341_v46  ;;  %v1342_v53 = vadd.f32 1.0, %v1969_v49  ;;  %v899_v14 = vpop.permute.xlu1 %898 }
 0x22c   : > { %v1973_v54 = vpop.eup %1972  ;;  %1998 = vrcp.f32 %v1361_v50  ;;  %v1362_v56 = vadd.f32 1.0, %v1971_v58  ;;  %v1798_v50 = vmul.f32 -1.442695, %v1154_v27  ;;  %v1183_v5 = vpop.f32.mrf.mxu1 }
 0x22d   : > { %v1975_v1 = vpop.eup %1974  ;;  %2000 = vrcp.f32 %v1342_v53  ;;  %v1343_v3 = vadd.f32 1.0, %v1973_v54  ;;  %v1102_v53 = vadd.f32 %v1101_v39, %v2749_v62  ;;  %v1168_v62 = vadd.f32 %v2818_v34, %v889_v42 }
 0x22e   : > { %v1977_v57 = vpop.eup %1976  ;;  %2002 = vrcp.f32 %v1362_v56  ;;  %v1363_v59 = vadd.f32 1.0, %v1975_v1  ;;  %v894_v56 = vpop.permute.xlu0 %893  ;;  %v1162_v1 = vadd.f32 %v2795_v19, %v884_v20 }
 0x22f   : > { %v1979_v7 = vpop.eup %1978  ;;  %2004 = vrcp.f32 %v1343_v3  ;;  %v1344_v9 = vadd.f32 1.0, %v1977_v57  ;;  %v1780_v57 = vmul.f32 -1.442695, %v1100_v44  ;;  %v1781_v12 = vmul.f32 -1.442695, %v1102_v53  ;;  %v1185_v20 = vpop.f32.mrf.mxu1 }
 0x230   : > { %v1981_v10 = vpop.eup %1980  ;;  %2006 = vrcp.f32 %v1363_v59  ;;  %v1364_v13 = vadd.f32 1.0, %v1979_v7  ;;  %v1166_v59 = vadd.f32 %v2808_v31, %v889_v42  ;;  %v1174_v31 = vadd.f32 %v2822_v4, %v894_v56 }
 0x231   : > { %v1983_v17 = vpop.eup %1982  ;;  %2008 = vrcp.f32 %v1344_v9  ;;  %v1345_v18 = vadd.f32 1.0, %v1981_v10  ;;  %v1800_v9 = vmul.f32 -1.442695, %v1160_v0  ;;  %v1803_v27 = vmul.f32 -1.442695, %v1168_v62 }
 0x232   : > { %v1985_v22 = vpop.eup %1984  ;;  %2010 = vrcp.f32 %v1364_v13  ;;  %v1365_v24 = vadd.f32 1.0, %v1983_v17  ;;  %v1172_v13 = vadd.f32 %v2820_v47, %v894_v56  ;;  %v1801_v17 = vmul.f32 -1.442695, %v1162_v1 }
 0x233   : > { %v1987_v28 = vpop.eup %1986  ;;  %2012 = vrcp.f32 %v1345_v18  ;;  %v1346_v30 = vadd.f32 1.0, %v1985_v22  ;;  %v1802_v15 = vmul.f32 -1.442695, %v1166_v59  ;;  %v1178_v22 = vadd.f32 %v1177_v60, %v899_v14 }
 0x234   : > { %v1989_v61 = vpop.eup %1988  ;;  %2014 = vrcp.f32 %v1365_v24  ;;  %v1366_v36 = vadd.f32 1.0, %v1987_v28  ;;  %v904_v24 = vpop.permute.xlu0 %903  ;;  %v1180_v28 = vadd.f32 %v1179_v45, %v899_v14  ;;  %v1805_v4 = vmul.f32 -1.442695, %v1174_v31 }
 0x235   : > { %v1991_v40 = vpop.eup %1990  ;;  %2016 = vrcp.f32 %v1346_v30  ;;  %v1347_v41 = vadd.f32 1.0, %v1989_v61  ;;  %v1804_v30 = vmul.f32 -1.442695, %v1172_v13  ;;  %v1184_v26 = vadd.f32 %v1183_v5, %v904_v24 }
 0x236   : > { %v2829_v46 = vpop.eup %1992  ;;  %2018 = vrcp.f32 %v1366_v36  ;;  %v1367_v49 = vadd.f32 1.0, %v1991_v40  ;;  %v1186_v36 = vadd.f32 %v1185_v20, %v904_v24  ;;  %v1806_v60 = vmul.f32 -1.442695, %v1178_v22 }
 0x237   : > { %v2832_v58 = vpop.eup %1994  ;;  %2020 = vrcp.f32 %v1347_v41  ;;  %v1807_v40 = vmul.f32 -1.442695, %v1180_v28 }
 0x238   : > { %v2835_v54 = vpop.eup %1996  ;;  %2022 = vrcp.f32 %v1367_v49  ;;  %v1809_v45 = vmul.f32 -1.442695, %v1186_v36  ;;  %v2092_v36 = vld [vmem:[%s2479_s16 + $0x10] sm:$0xff] }
 0x239   : > { %v2838_v3 = vpop.eup %1998  ;;  %2024 = vpow2.f32 %v1778_v43  ;;  %v1808_v43 = vmul.f32 -1.442695, %v1184_v26 }
 0x23a   : > { %v2841_v7 = vpop.eup %2000  ;;  %2026 = vpow2.f32 %v1798_v50 }
 0x23b   : > { %v2844_v10 = vpop.eup %2002  ;;  %2028 = vpow2.f32 %v1779_v51 }
 0x23c   : > { %v2847_v19 = vpop.eup %2004  ;;  %2030 = vpow2.f32 %v1799_v63 }
 0x23d   : > { %v2850_v18 = vpop.eup %2006  ;;  %2032 = vpow2.f32 %v1780_v57 }
 0x23e   : > { %v2852_v34 = vpop.eup %2008  ;;  %2034 = vpow2.f32 %v1800_v9 }
 0x23f   : > { %v2854_v47 = vpop.eup %2010  ;;  %2036 = vpow2.f32 %v1781_v12 }
 0x240   : > { %v2856_v61 = vpop.eup %2012  ;;  %2038 = vpow2.f32 %v1801_v17  ;;  %v2088_v17 = vld [vmem:[%s2479_s16] sm:$0xff] }
 0x241   : > { %v2858_v38 = vpop.eup %2014  ;;  %2040 = vpow2.f32 %v1802_v15  ;;  %v2870_v31 = vmul.f32 %v2088_v17, %v2768_v48  ;;  %v2089_v15 = vld [vmem:[%s2458_s9 + $0x20] sm:$0xff]  ;;  %v2101_v17 = vld [vmem:[%s2458_s9 + $0x48] sm:$0xff] }
 0x242   : > { %v2860_v39 = vpop.eup %2016  ;;  %2042 = vpow2.f32 %v1803_v27  ;;  %v1496_v22 = vmul.f32 %v2089_v15, %v2772_v52  ;;  %v2090_v27 = vld [vmem:[%s2479_s16 + $0x8] sm:$0xff]  ;;  %v2882_v52 = vmul.f32 %v2092_v36, %v2783_v6  ;;  %v2096_v6 = vld [vmem:[%s2479_s16 + $0x18] sm:$0xff] }
 0x243   : > { %v2862_v41 = vpop.eup %2018  ;;  %2044 = vpow2.f32 %v1804_v30  ;;  %v2876_v28 = vmul.f32 %v2090_v27, %v2775_v55  ;;  %v2091_v30 = vld [vmem:[%s2458_s9 + $0x28] sm:$0xff] }
 0x244   : > { %v2864_v44 = vpop.eup %2020  ;;  %2046 = vpow2.f32 %v1805_v4  ;;  %v1497_v26 = vmul.f32 %v2091_v30, %v2778_v2 }
 0x245   : > { %v2866_v42 = vpop.eup %2022  ;;  %2048 = vpow2.f32 %v1806_v60  ;;  %v2093_v60 = vld [vmem:[%s2479_s16 + $0x20] sm:$0xff] }
 0x246   : > { %v2025_v49 = vpop.eup %2024  ;;  %2050 = vpow2.f32 %v1807_v40  ;;  %v1480_v40 = vmul.f32 %v2093_v60, %v2797_v21  ;;  %v2097_v21 = vld [vmem:[%s2458_s9 + $0x38] sm:$0xff] }
 0x247   : > { %v2027_v50 = vpop.eup %2026  ;;  %v1348_v0 = vadd.f32 1.0, %v2025_v49  ;;  %2052 = vpow2.f32 %v1808_v43  ;;  %v2095_v49 = vld [vmem:[%s2479_s16 + $0x28] sm:$0xff] }
 0x248   : > { %v2029_v51 = vpop.eup %2028  ;;  %v1368_v53 = vadd.f32 1.0, %v2027_v50  ;;  %2054 = vpow2.f32 %v1809_v45  ;;  %v2094_v45 = vld [vmem:[%s2458_s9 + $0x30] sm:$0xff]  ;;  %v1481_v50 = vmul.f32 %v2095_v49, %v2803_v25  ;;  %v2109_v49 = vld [vmem:[%s2466_s24] sm:$0xff] }
 0x249   : > { %v2031_v56 = vpop.eup %2030  ;;  %2056 = vrcp.f32 %v1348_v0  ;;  %v1349_v63 = vadd.f32 1.0, %v2029_v51  ;;  %v1498_v2 = vmul.f32 %v2094_v45, %v2786_v8 }
 0x24a   : > { %v2033_v1 = vpop.eup %2032  ;;  %2058 = vrcp.f32 %v1368_v53  ;;  %v1369_v57 = vadd.f32 1.0, %v2031_v56  ;;  %v2892_v53 = vmul.f32 %v2096_v6, %v2789_v11  ;;  %v1499_v56 = vmul.f32 %v2097_v21, %v2792_v16 }
 0x24b   : > { %v2035_v59 = vpop.eup %2034  ;;  %2060 = vrcp.f32 %v1349_v63  ;;  %v1350_v5 = vadd.f32 1.0, %v2033_v1  ;;  %v1512_v11 = vadd.f32 %v1496_v22, %v1480_v40  ;;  %v2103_v22 = vld [vmem:[%s2479_s16 + $0x40] sm:$0xff]  ;;  %v2106_v40 = vld [vmem:[%s2479_s16 + $0x48] sm:$0xff] }
 0x24c   : > { %v2037_v9 = vpop.eup %2036  ;;  %2062 = vrcp.f32 %v1369_v57  ;;  %v1370_v62 = vadd.f32 1.0, %v2035_v59  ;;  %v2098_v57 = vld [vmem:[%s2458_s9 + $0x40] sm:$0xff]  ;;  %v2099_v59 = vld [vmem:[%s2479_s16 + $0x30] sm:$0xff] }
 0x24d   : > { %v2039_v12 = vpop.eup %2038  ;;  %2064 = vrcp.f32 %v1350_v5  ;;  %v1351_v13 = vadd.f32 1.0, %v2037_v9  ;;  %v1500_v8 = vmul.f32 %v2098_v57, %v2800_v23  ;;  %v1482_v25 = vmul.f32 %v2099_v59, %v2810_v32  ;;  %v2112_v57 = vld [vmem:[%s2466_s24 + $0x28] sm:$0xff] }
 0x24e   : > { %v2041_v14 = vpop.eup %2040  ;;  %2066 = vrcp.f32 %v1370_v62  ;;  %v1371_v20 = vadd.f32 1.0, %v2039_v12  ;;  %v2100_v62 = vld [vmem:[%s2479_s16 + $0x38] sm:$0xff]  ;;  %v1501_v23 = vmul.f32 %v2101_v17, %v2806_v29  ;;  %v2117_v17 = vld [vmem:[%s2466_s24 + $0x10] sm:$0xff] }
 0x24f   : > { %v2043_v24 = vpop.eup %2042  ;;  %2068 = vrcp.f32 %v1351_v13  ;;  %v1372_v4 = vadd.f32 1.0, %v2041_v14  ;;  %v1483_v12 = vmul.f32 %v2100_v62, %v2814_v35  ;;  %v1513_v14 = vadd.f32 %v1497_v26, %v1481_v50 }
 0x250   : > { %v2045_v48 = vpop.eup %2044  ;;  %2070 = vrcp.f32 %v1371_v20  ;;  %v1373_v43 = vadd.f32 1.0, %v2043_v24  ;;  %v2102_v20 = vld [vmem:[%s2458_s9 + $0x50] sm:$0xff]  ;;  %v1484_v35 = vmul.f32 %v2103_v22, %v2829_v46  ;;  %v1514_v26 = vadd.f32 %v1498_v2, %v1482_v25  ;;  %v2108_v2 = vld [vmem:[%s2458_s9 + $0x60] sm:$0xff]  ;;  %v2113_v25 = vld [vmem:[%s2466_s24 + $0x8] sm:$0xff] }
 0x251   : > { %v2047_v55 = vpop.eup %2046  ;;  %2072 = vrcp.f32 %v1372_v4  ;;  %v1374_v0 = vadd.f32 1.0, %v2045_v48  ;;  %v2906_v24 = vmul.f32 %v2102_v20, %v2812_v33  ;;  %v2104_v4 = vld [vmem:[%s2458_s9 + $0x58] sm:$0xff]  ;;  %v2105_v48 = vld [vmem:[%s2458_s9] sm:$0xff]  ;;  %v2915_v60 = vadd.f32 %v1499_v56, %v1483_v12  ;;  %v2111_v56 = vld [vmem:[%s2458_s9 + $0x68] sm:$0xff] }
 0x252   : > { %v2049_v51 = vpop.eup %2048  ;;  %2074 = vrcp.f32 %v1373_v43  ;;  %v1375_v63 = vadd.f32 1.0, %v2047_v55  ;;  %v2912_v29 = vmul.f32 %v2104_v4, %v2816_v37  ;;  %v1485_v46 = vmul.f32 %v2106_v40, %v2835_v54  ;;  %v2107_v43 = vld [vmem:[%s2466_s24 + $0x20] sm:$0xff]  ;;  %v2121_v4 = vld [vmem:[%s2466_s24 + $0x38] sm:$0xff] }
 0x253   : > { %v2051_v1 = vpop.eup %2050  ;;  %2076 = vrcp.f32 %v1374_v0  ;;  %v1376_v5 = vadd.f32 1.0, %v2049_v51  ;;  %v2922_v37 = vmul.f32 %v2108_v2, %v2832_v58  ;;  %v1524_v50 = vmul.f32 %v2109_v49, %v2854_v47  ;;  %v2110_v51 = vld [vmem:[%s2458_s9 + $0x8] sm:$0xff] }
 0x254   : > { %v2053_v9 = vpop.eup %2052  ;;  %2078 = vrcp.f32 %v1375_v63  ;;  %v1377_v16 = vadd.f32 1.0, %v2051_v1  ;;  %v1516_v54 = vadd.f32 %v1500_v8, %v1484_v35  ;;  %v2930_v63 = vmul.f32 %v2111_v56, %v2838_v3  ;;  %v2119_v35 = vld [vmem:[%s2479_s16 + $0x58] sm:$0xff] }
 0x255   : > { %v2055_v13 = vpop.eup %2054  ;;  %2080 = vrcp.f32 %v1376_v5  ;;  %v1378_v32 = vadd.f32 1.0, %v2053_v9  ;;  %v1525_v47 = vmul.f32 %v2113_v25, %v2858_v38  ;;  %v2114_v9 = vld [vmem:[%s2458_s9 + $0x10] sm:$0xff]  ;;  %v1517_v12 = vadd.f32 %v1501_v23, %v1485_v46  ;;  %v2123_v46 = vld [vmem:[%s2466_s24 + $0x40] sm:$0xff] }
 0x256   : > { %v2057_v15 = vpop.eup %2056  ;;  %2082 = vrcp.f32 %v1377_v16  ;;  %v1379_v27 = vadd.f32 1.0, %v2055_v13  ;;  %v2115_v16 = vld [vmem:[%s2479_s16 + $0x50] sm:$0xff] }
 0x257   : > { %v2059_v30 = vpop.eup %2058  ;;  %v1492_v36 = vmul.f32 %v2105_v48, %v2057_v15  ;;  %2084 = vrcp.f32 %v1378_v32  ;;  %v1486_v3 = vmul.f32 %v2115_v16, %v2841_v7  ;;  %v2116_v38 = vld [vmem:[%s2466_s24 + $0x30] sm:$0xff]  ;;  %v1526_v32 = vmul.f32 %v2117_v17, %v2862_v41  ;;  %v2118_v15 = vld [vmem:[%s2458_s9 + $0x18] sm:$0xff] }
 0x258   : > { %v2061_v33 = vpop.eup %2060  ;;  %v1528_v55 = vmul.f32 %v2107_v43, %v2059_v30  ;;  %2086 = vrcp.f32 %v1379_v27  ;;  %v2120_v27 = vld [vmem:[%s2479_s16 + $0x60] sm:$0xff]  ;;  %v2130_v25 = vld [vmem:[%s2458_s9 + $0x70] sm:$0xff] }
 0x259   : > { %v2063_v45 = vpop.eup %2062  ;;  %v1508_v0 = vadd.f32 %v1492_v36, %v2870_v31  ;;  %v1493_v6 = vmul.f32 %v2110_v51, %v2061_v33  ;;  %v1488_v30 = vmul.f32 %v2120_v27, %v2852_v34  ;;  %v2122_v33 = vld [vmem:[%s2466_s24 + $0x18] sm:$0xff] }
 0x25a   : > { %v2065_v21 = vpop.eup %2064  ;;  %v1544_v1 = vadd.f32 %v1528_v55, %v1512_v11  ;;  %v1529_v58 = vmul.f32 %v2112_v57, %v2063_v45  ;;  %v1518_v55 = vadd.f32 %v2906_v24, %v1486_v3 }
 0x25b   : > { %v2067_v59 = vpop.eup %2066  ;;  %v1540_v31 = vadd.f32 %v1524_v50, %v1508_v0  ;;  %v1509_v5 = vadd.f32 %v1493_v6, %v2876_v28  ;;  %v1494_v62 = vmul.f32 %v2114_v9, %v2065_v21  ;;  %v2126_v0 = vld [vmem:[%s2479_s16 + $0x70] sm:$0xff]  ;;  %v2132_v9 = vld [vmem:[%s2458_s9 + $0x78] sm:$0xff] }
 0x25c   : > { %v2069_v8 = vpop.eup %2068  ;;  %1560 = vst [vmem:[%s2940_s28 + $0x20] sm:$0xff] %v1544_v1  ;;  %v1545_v11 = vadd.f32 %v1529_v58, %v1513_v14  ;;  %v1530_v13 = vmul.f32 %v2116_v38, %v2067_v59  ;;  %v1487_v14 = vmul.f32 %v2119_v35, %v2847_v19  ;;  %v2127_v6 = vld [vmem:[%s2466_s24 + $0x50] sm:$0xff]  ;;  %v2129_v58 = vld [vmem:[%s2466_s24 + $0x58] sm:$0xff] }
 0x25d   : > { %v2071_v28 = vpop.eup %2070  ;;  %1556 = vst [vmem:[%s2940_s28] sm:$0xff] %v1540_v31  ;;  %v1541_v23 = vadd.f32 %v1525_v47, %v1509_v5  ;;  %v1510_v7 = vadd.f32 %v1494_v62, %v2882_v52  ;;  %v1495_v20 = vmul.f32 %v2118_v15, %v2069_v8  ;;  %v1527_v52 = vmul.f32 %v2122_v33, %v2866_v42  ;;  %v2125_v42 = vld [vmem:[%s2466_s24 + $0x48] sm:$0xff]  ;;  %v2131_v31 = vld [vmem:[%s2466_s24 + $0x60] sm:$0xff]  ;;  %v2134_v38 = vld [vmem:[%s2466_s24 + $0x70] sm:$0xff] }
 0x25e   : > { %v2073_v22 = vpop.eup %2072  ;;  %1561 = vst [vmem:[%s2940_s28 + $0x28] sm:$0xff] %v1545_v11  ;;  %v1546_v41 = vadd.f32 %v1530_v13, %v1514_v26  ;;  %v1531_v48 = vmul.f32 %v2121_v4, %v2071_v28  ;;  %v2124_v26 = vld [vmem:[%s2479_s16 + $0x68] sm:$0xff]  ;;  %v1519_v56 = vadd.f32 %v2912_v29, %v1487_v14  ;;  %v1520_v47 = vadd.f32 %v2922_v37, %v1488_v30  ;;  %v2135_v28 = vld [vmem:[%s2466_s24 + $0x78] sm:$0xff] }
 0x25f   : > { %v2075_v36 = vpop.eup %2074  ;;  %1557 = vst [vmem:[%s2940_s28 + $0x8] sm:$0xff] %v1541_v23  ;;  %v1542_v40 = vadd.f32 %v1526_v32, %v1510_v7  ;;  %v1511_v19 = vadd.f32 %v1495_v20, %v2892_v53  ;;  %v1532_v43 = vmul.f32 %v2123_v46, %v2073_v22  ;;  %v1489_v45 = vmul.f32 %v2124_v26, %v2856_v61 }
 0x260   : > { %v2077_v34 = vpop.eup %2076  ;;  %1562 = vst [vmem:[%s2940_s28 + $0x30] sm:$0xff] %v1546_v41  ;;  %v1547_v2 = vadd.f32 %v1531_v48, %v2915_v60  ;;  %v1533_v49 = vmul.f32 %v2125_v42, %v2075_v36  ;;  %v1490_v53 = vmul.f32 %v2126_v0, %v2860_v39  ;;  %v2128_v60 = vld [vmem:[%s2479_s16 + $0x78] sm:$0xff]  ;;  %v1507_v62 = vmul.f32 %v2132_v9, %v2850_v18  ;;  %s1588_s16 = sshll.u32 %s2940_s28, 4  ;;  %s2998_s16 = int_to_ptr.vmem [resolvable:$true] %s1588_s16 }
 0x261   : > { %v2079_v50 = vpop.eup %2078  ;;  %1558 = vst [vmem:[%s2940_s28 + $0x10] sm:$0xff] %v1542_v40  ;;  %v1543_v51 = vadd.f32 %v1527_v52, %v1511_v19  ;;  %v1548_v24 = vadd.f32 %v1532_v43, %v1516_v54  ;;  %v1534_v21 = vmul.f32 %v2127_v6, %v2077_v34  ;;  %v1491_v1 = vmul.f32 %v2128_v60, %v2864_v44  ;;  %s2192_s17 = scalar_lea.vmem %s2998_s16, 2048 }
 0x262   : > { %v2081_v61 = vpop.eup %2080  ;;  %1563 = vst [vmem:[%s2940_s28 + $0x38] sm:$0xff] %v1547_v2  ;;  %v1549_v57 = vadd.f32 %v1533_v49, %v1517_v12  ;;  %v1535_v39 = vmul.f32 %v2129_v58, %v2079_v50  ;;  %v1506_v54 = vmul.f32 %v2130_v25, %v2844_v10  ;;  %v1521_v8 = vadd.f32 %v2930_v63, %v1489_v45  ;;  %v2133_v12 = vld [vmem:[%s2466_s24 + $0x68] sm:$0xff]  ;;  %p2193_p8 = scmp.ne.s32.totalorder %s2998_s16, %s2192_s17  ;;  %s2284_s24 = smov [#allocation7]  }
 0x263   : > { %v2083_v59 = vpop.eup %2082  ;;  %1559 = vst [vmem:[%s2940_s28 + $0x18] sm:$0xff] %v1543_v51  ;;  %1564 = vst [vmem:[%s2940_s28 + $0x40] sm:$0xff] %v1548_v24  ;;  %v1550_v29 = vadd.f32 %v1534_v21, %v1518_v55  ;;  %v1536_v44 = vmul.f32 %v2131_v31, %v2081_v61  ;;  %v1523_v13 = vadd.f32 %v1507_v62, %v1491_v1  ;;  %s2196_s15 = sshll.u32 %s2284_s24, 4  ;;  %s2197_s15 = int_to_ptr.vmem [resolvable:$false] %s2196_s15 }
 0x264   : > { %v2085_v5 = vpop.eup %2084  ;;  %1565 = vst [vmem:[%s2940_s28 + $0x48] sm:$0xff] %v1549_v57  ;;  %v1551_v10 = vadd.f32 %v1535_v39, %v1519_v56  ;;  %v1537_v37 = vmul.f32 %v2133_v12, %v2083_v59  ;;  %v1522_v3 = vadd.f32 %v1506_v54, %v1490_v53  ;;  %p2194_p2 = pnand %p2193_p8, %p2388_p9  ;;  %s2198_s1 = scalar_lea.vmem %s2197_s15, 4096 }
 0x265   : > { %v2087_v16 = vpop.eup %2086  ;;  %1566 = vst [vmem:[%s2940_s28 + $0x50] sm:$0xff] %v1550_v29  ;;  %v1552_v11 = vadd.f32 %v1536_v44, %v1520_v47  ;;  %v1538_v18 = vmul.f32 %v2134_v38, %v2085_v5  ;;  %p2199_p6 = scmp.lt.s32.totalorder %s2998_s16, %s2197_s15  ;;  %p2200_p4 = scmp.lt.s32.totalorder %s2198_s1, %s2192_s17 }
 0x266   : > { %1567 = vst [vmem:[%s2940_s28 + $0x58] sm:$0xff] %v1551_v10  ;;  %v1553_v63 = vadd.f32 %v1537_v37, %v1521_v8  ;;  %v1539_v17 = vmul.f32 %v2135_v28, %v2087_v16  ;;  %p2195_p5 = pneg %p2194_p2 }
 0x267   : > { %1568 = vst [vmem:[%s2940_s28 + $0x60] sm:$0xff] %v1552_v11  ;;  %v1554_v32 = vadd.f32 %v1538_v18, %v1522_v3  ;;  %p2201_p7 = por %p2200_p4, %p2199_p6 }
 0x268   : > { %1569 = vst [vmem:[%s2940_s28 + $0x68] sm:$0xff] %v1553_v63  ;;  %v1555_v23 = vadd.f32 %v1539_v17, %v1523_v13 }
 0x269   : > { %1570 = vst [vmem:[%s2940_s28 + $0x70] sm:$0xff] %v1554_v32  ;;  %p2202_p10 = pnand %p2201_p7, %p2195_p5 }
 0x26a   : > { %1571 = vst [vmem:[%s2940_s28 + $0x78] sm:$0xff] %v1555_v23 }
 0x26b   : > { %2205 = shalt.err (!%p2202_p10)
}
 0x26c   : > { %s2206_s27 = scalar_lea.hbm %s2996_s29, 2048  ;;  %s2210_s18 = scalar_lea.hbm %s3080_s23, 4096 }
 0x26d   : > { %p2207_p1 = scmp.ne.s32.totalorder %s2996_s29, %s2206_s27  ;;  %p2211_p0 = scmp.lt.s32.totalorder %s2996_s29, %s3080_s23 }
 0x26e   : > { %p2212_p8 = scmp.lt.s32.totalorder %s2210_s18, %s2206_s27 }
 0x26f   : > { %p2208_p13 = pnand %p2207_p1, %p2388_p9 }
 0x270   : > { %p2213_p2 = por %p2212_p8, %p2211_p0 }
 0x271   : > { %p2209_p3 = pneg %p2208_p13 }
 0x273   : > { %p2214_p5 = pnand %p2213_p2, %p2209_p3 }
 0x275   : > { %2217 = shalt.err (!%p2214_p5)
}
 0x276   : > { %s2285_s28 = smov 256   ;;  %s2286_s25 = smov 16  }
 0x277   : > { %1825 = dma.vmem_to_hbm [thread:$0]  (%p2388_p9), %s2998_s16, 2048, %s2996_s29, %s1573_s19, %s2285_s28, %s2285_s28, %s2286_s25  }
 0x278 PF: > { %s3081_s12 = sld [smem:[#allocation11_spill]]  ;;  %p1835_p6 = pnand %p1722_p12, %p2395_p11 }
 0x27a   : > { %p1836_p4 = pneg %p1835_p6 }
 0x27e   : > { %s1603_s17 = sand.u32 1, %s3081_s12  }
 0x27f   : > { %s1604_s24 = scalar_lea.sflag [#allocation4], %s1603_s17 }
 0x280   : > { %2251 = dma.done.wait (%p1836_p4), %s1604_s24, 2048  }
 0x281   : > { %2253 = vsyncadd (%p1836_p4), %s1604_s24, 4294965248  ;;  %s28_s14 = sadd.s32 1, %s2276_s14   ;;  %s3083_s15 = sld [smem:[#allocation12_spill]] }
 0x282   : > { %p25_p7 = scmp.ge.s32.totalorder %s28_s14, 4   ;;  %s3084_s11 = sld [smem:[#allocation14_spill]] }
 0x283   : > { %s3085_s22 = sld [smem:[#allocation13_spill]]  ;;  %s3086_s30 = smov %s2260_s10 }
 0x284   : > { %s3088_s12 = smov %s2272_s13 }
 0x285   :  { %27 = sbr.rel (!%p25_p7) target bundleno = 11 (0xb), region = 117 }
 0x287   : > { %s3087_s10 = smov %s3083_s15 }
 0x289   : > { %s3089_s13 = smov %s3085_s22 }
 0x28a   :  { %1609 = vsyncpa [#allocation3], 1 }
 0x28b   :  { %1611 = vsyncpa [#allocation3 + $0x1], 1 }
 0x28c   :  { %1612 = vsyncpa [#allocation6], 1 }
 0x28d   :  { %1614 = vsyncpa [#allocation6 + $0x1], 1 }
 0x28e   :  { %1615 = vsyncpa [#allocation4], 1 }
 0x28f   :  { %1617 = vsyncpa [#allocation4 + $0x1], 1 }

</bundles_post_ra>
